<compile_context>
chip_gen: v7x
topology: tpu7x:2x2x1
jax: 0.10.0
libtpu: 0.0.40
codegen_flags: <defaults>
</compile_context>

<pallas_src>
import functools
import math

import jax
import jax.numpy as jnp
import numpy as np
from jax.experimental import pallas as pl
from jax.experimental.pallas import tpu as pltpu


# ------------------------------ Pallas kernel ------------------------------ #

def _mlp_kernel(x_ref, w1t_ref, b1_ref, pool_ref, o_ref):
    # fc1: (TILE_M, Cin) @ (Cin, H) + b1  -- stays entirely in VMEM.
    h = jnp.dot(x_ref[...], w1t_ref[...],
                preferred_element_type=jnp.float32) + b1_ref[...]
    # GELU (tanh approximation; see TODO above).
    c = 0.7978845608028654  # sqrt(2/pi)
    h = 0.5 * h * (1.0 + jnp.tanh(c * (h + 0.044715 * h * h * h)))
    # AdaptiveAvgPool1d over the hidden dim, expressed as a matmul with a
    # fixed averaging matrix -> runs on the MXU, output is lane-dense.
    o_ref[...] = jnp.dot(h, pool_ref[...],
                         preferred_element_type=jnp.float32).astype(o_ref.dtype)


# ----------------------------- wrapper / glue ------------------------------ #

def adaptive_avg_pool_matrix(in_len, out_len):
    """(in_len, out_len) matrix implementing torch.nn.AdaptiveAvgPool1d."""
    p = np.zeros((in_len, out_len), dtype=np.float32)
    for i in range(out_len):
        s = (i * in_len) // out_len
        e = math.ceil((i + 1) * in_len / out_len)
        p[s:e, i] = 1.0 / (e - s)
    return jnp.asarray(p)


@functools.partial(jax.jit, static_argnames=("tile_m",))
def mlp_forward(x, fc1_w, fc1_b, pool_mat, *, tile_m=128):
    B, N, Cin = x.shape
    H = fc1_w.shape[0]
    Cout = pool_mat.shape[1]
    assert fc1_w.shape == (H, Cin) and tile_m % 8 == 0

    M = B * N
    x2d = x.reshape(M, Cin)
    Mp = pl.cdiv(M, tile_m) * tile_m
    if Mp != M:                                   # pad rows up to the tile size
        x2d = jnp.pad(x2d, ((0, Mp - M), (0, 0)))

    out2d = pl.pallas_call(
        _mlp_kernel,
        out_shape=jax.ShapeDtypeStruct((Mp, Cout), x.dtype),
        grid=(Mp // tile_m,),
        in_specs=[
            pl.BlockSpec((tile_m, Cin), lambda i: (i, 0)),   # streamed row tiles
            pl.BlockSpec((Cin, H), lambda i: (0, 0)),        # resident fc1 weight
            pl.BlockSpec((1, H), lambda i: (0, 0)),          # resident fc1 bias
            pl.BlockSpec((H, Cout), lambda i: (0, 0)),       # resident pool matrix
        ],
        out_specs=pl.BlockSpec((tile_m, Cout), lambda i: (i, 0)),
        compiler_params=pltpu.CompilerParams(
            dimension_semantics=("parallel",),
            vmem_limit_bytes=32 * 1024 * 1024,
        ),
    )(x2d, fc1_w.T, fc1_b.reshape(1, H), pool_mat)

    return out2d[:M].reshape(B, N, Cout)


# --------------------------- pure-JAX reference ----------------------------- #

def mlp_reference(x, fc1_w, fc1_b, out_features):
    h = jnp.einsum('bnc,hc->bnh', x, fc1_w,
                   precision=jax.lax.Precision.HIGHEST) + fc1_b
    h = jax.nn.gelu(h, approximate=False)          # torch nn.GELU() (exact erf)
    L = h.shape[-1]
    cols = []
    for i in range(out_features):                  # torch AdaptiveAvgPool1d
        s = (i * L) // out_features
        e = math.ceil((i + 1) * L / out_features)
        cols.append(h[..., s:e].mean(axis=-1))
    return jnp.stack(cols, axis=-1)


# ----------------------------------- main ----------------------------------- #

if __name__ == "__main__":
    B, N = 2, 256              # 256 tokens = 16x16 spatial grid
    in_features = 128
    hidden_features = 512      # mlp_ratio = 4
    out_features = in_features # out_features=None -> in_features in the module

    key = jax.random.PRNGKey(0)
    k_w, k_b, k_x = jax.random.split(key, 3)
    bound = 1.0 / math.sqrt(in_features)           # torch Linear init scale
    fc1_w = bound * jax.random.normal(k_w, (hidden_features, in_features), jnp.float32)
    fc1_b = bound * jax.random.normal(k_b, (hidden_features,), jnp.float32)
    x = jax.random.normal(k_x, (B, N, in_features), jnp.float32)

    pool_mat = adaptive_avg_pool_matrix(hidden_features, out_features)

    out = mlp_forward(x, fc1_w, fc1_b, pool_mat, tile_m=128)
    out = jax.block_until_ready(out)
    assert out.shape == (B, N, out_features)

    ref = mlp_reference(x, fc1_w, fc1_b, out_features)
    err = float(jnp.max(jnp.abs(out - ref)))
    assert err < 5e-3, f"max abs error {err}"

    print("KERNEL_OK")
</pallas_src>

<mosaic_0001>
module attributes {stable_mosaic.version = 11 : i64} {
  func.func @_mlp_kernel(%arg0: i32, %arg1: memref<128x128xf32, #tpu.memory_space<vmem>>, %arg2: memref<128x512xf32, #tpu.memory_space<vmem>>, %arg3: memref<1x512xf32, #tpu.memory_space<vmem>>, %arg4: memref<512x128xf32, #tpu.memory_space<vmem>>, %arg5: memref<128x128xf32, #tpu.memory_space<vmem>>) attributes {dimension_semantics = [#tpu.dimension_semantics<parallel>], iteration_bounds = array<i64: 4>, scalar_prefetch = 0 : i64, scratch_operands = 0 : i64, tpu.core_type = #tpu.core_type<tc>, window_params = [{transform_indices = @transform_0, window_bounds = array<i64: 128, 128>}, {pipeline_mode = #tpu.pipeline_mode<synchronous>, transform_indices = @transform_1, window_bounds = array<i64: 128, 512>}, {pipeline_mode = #tpu.pipeline_mode<synchronous>, transform_indices = @transform_2, window_bounds = array<i64: 1, 512>}, {pipeline_mode = #tpu.pipeline_mode<synchronous>, transform_indices = @transform_3, window_bounds = array<i64: 512, 128>}, {transform_indices = @transform_4, window_bounds = array<i64: 128, 128>}]} {
    %c0 = arith.constant 0 : index
    %c0_0 = arith.constant 0 : index
    %0 = vector.load %arg1[%c0, %c0_0] : memref<128x128xf32, #tpu.memory_space<vmem>>, vector<128x128xf32>
    %c0_1 = arith.constant 0 : index
    %c0_2 = arith.constant 0 : index
    %1 = vector.load %arg2[%c0_1, %c0_2] : memref<128x512xf32, #tpu.memory_space<vmem>>, vector<128x512xf32>
    %cst = arith.constant dense<0.000000e+00> : vector<128x512xf32>
    %2 = tpu.matmul %0, %1, %cst {dimension_numbers = #tpu.dot_dimension_numbers<[1], [0], [0], [1], [0, 0, 1, 1], [], []>} : vector<128x128xf32>, vector<128x512xf32>, vector<128x512xf32> -> vector<128x512xf32>
    %c0_3 = arith.constant 0 : index
    %c0_4 = arith.constant 0 : index
    %3 = vector.load %arg3[%c0_3, %c0_4] : memref<1x512xf32, #tpu.memory_space<vmem>>, vector<1x512xf32>
    %4 = vector.broadcast %3 : vector<1x512xf32> to vector<128x512xf32>
    %5 = arith.addf %2, %4 : vector<128x512xf32>
    %cst_5 = arith.constant 5.000000e-01 : f32
    %6 = vector.broadcast %cst_5 : f32 to vector<128x512xf32>
    %7 = arith.mulf %6, %5 : vector<128x512xf32>
    %cst_6 = arith.constant 4.471500e-02 : f32
    %8 = vector.broadcast %cst_6 : f32 to vector<128x512xf32>
    %9 = arith.mulf %8, %5 : vector<128x512xf32>
    %10 = arith.mulf %9, %5 : vector<128x512xf32>
    %11 = arith.mulf %10, %5 : vector<128x512xf32>
    %12 = arith.addf %5, %11 : vector<128x512xf32>
    %cst_7 = arith.constant 0.797884583 : f32
    %13 = vector.broadcast %cst_7 : f32 to vector<128x512xf32>
    %14 = arith.mulf %13, %12 : vector<128x512xf32>
    %15 = math.tanh %14 : vector<128x512xf32>
    %cst_8 = arith.constant 1.000000e+00 : f32
    %16 = vector.broadcast %cst_8 : f32 to vector<128x512xf32>
    %17 = arith.addf %16, %15 : vector<128x512xf32>
    %18 = arith.mulf %7, %17 : vector<128x512xf32>
    %c0_9 = arith.constant 0 : index
    %c0_10 = arith.constant 0 : index
    %19 = vector.load %arg4[%c0_9, %c0_10] : memref<512x128xf32, #tpu.memory_space<vmem>>, vector<512x128xf32>
    %cst_11 = arith.constant dense<0.000000e+00> : vector<128x128xf32>
    %20 = tpu.matmul %18, %19, %cst_11 {dimension_numbers = #tpu.dot_dimension_numbers<[1], [0], [0], [1], [0, 0, 1, 1], [], []>} : vector<128x512xf32>, vector<512x128xf32>, vector<128x128xf32> -> vector<128x128xf32>
    %c0_12 = arith.constant 0 : index
    %c0_13 = arith.constant 0 : index
    %21 = vector.load %arg5[%c0_12, %c0_13] : memref<128x128xf32, #tpu.memory_space<vmem>>, vector<128x128xf32>
    tpu.vector_store %arg5[%c0_12, %c0_13], %20 {strides = array<i32>} : memref<128x128xf32, #tpu.memory_space<vmem>>, vector<128x128xf32>,
    return
  }
  func.func @transform_0(%arg0: i32) -> (i32, i32) {
    %c0_i32 = arith.constant 0 : i32
    %c0_i32_0 = arith.constant 0 : i32
    return %arg0, %c0_i32 : i32, i32
  }
  func.func @transform_1(%arg0: i32) -> (i32, i32) {
    %c0_i32 = arith.constant 0 : i32
    %c0_i32_0 = arith.constant 0 : i32
    %c0_i32_1 = arith.constant 0 : i32
    return %c0_i32, %c0_i32_0 : i32, i32
  }
  func.func @transform_2(%arg0: i32) -> (i32, i32) {
    %c0_i32 = arith.constant 0 : i32
    %c0_i32_0 = arith.constant 0 : i32
    %c0_i32_1 = arith.constant 0 : i32
    return %c0_i32, %c0_i32_0 : i32, i32
  }
  func.func @transform_3(%arg0: i32) -> (i32, i32) {
    %c0_i32 = arith.constant 0 : i32
    %c0_i32_0 = arith.constant 0 : i32
    %c0_i32_1 = arith.constant 0 : i32
    return %c0_i32, %c0_i32_0 : i32, i32
  }
  func.func @transform_4(%arg0: i32) -> (i32, i32) {
    %c0_i32 = arith.constant 0 : i32
    %c0_i32_0 = arith.constant 0 : i32
    return %arg0, %c0_i32 : i32, i32
  }
}

</mosaic_0001>

<bundles_post_ra>
// kernel: mlp_forward.1
= control target key start
LH: loop header
LB: loop body
LE: loop exit
PB: predicated region body
PF: predicated region fallthrough
CT: control target
= control target key end

     0   :  { %9 = vsyncpa [#allocation3], 0  ;;  %s3559_s0 = inlined_call_operand.vmem [shape: f32[512,128], index: 0, kind: input, shape index: {}]   ;;  %s3560_s1 = inlined_call_operand.vmem [shape: f32[128,512], index: 1, kind: input, shape index: {}]   ;;  %s3561_s2 = inlined_call_operand.vmem [shape: f32[1,512], index: 2, kind: input, shape index: {}]   ;;  %s3562_s3 = inlined_call_operand.vmem [shape: f32[512,128], index: 3, kind: input, shape index: {}]   ;;  %s3563_s4 = inlined_call_operand.hbm [shape: f32[512,128], index: 4, kind: output, shape index: {}]  }
   0x1   :  { %11 = vsyncpa [#allocation3 + $0x1], 0  ;;  %s2209_s15 = smov 0   ;;  %s2211_s16 = smov 0  }
   0x2   :  { %s2213_s17 = smov 0   ;;  %s2215_s18 = smov 0  }
   0x3 LB: > { %s2230_s19 = sadd.s32 4294967295, %s2178_s18   ;;  %s1645_s20 = sadd.s32 4294967294, %s2178_s18   ;;  %s2178_s18 = sphi %s2215_s18, %s3720_s18   ;;  %s2174_s17 = sphi %s2213_s17, %s3719_s17   ;;  %s2170_s16 = sphi %s2211_s16, %s3718_s16   ;;  %s2166_s15 = sphi %s2209_s15, %s3717_s15  }
   0x4   : > { %s2234_s21 = sadd.s32 1, %s2178_s18   ;;  %s113_s22 = sadd.s32 1, %s2174_s17 }
   0x5   : > { %s110_s23 = ssub.s32 %s2178_s18, %s2234_s21  ;;  %p123_p0 = scmp.ne.s32.totalorder %s2174_s17, %s2170_s16 }
   0x6   : > { %p111_p1 = scmp.eq.s32.totalorder %s110_s23, 0  ;;  %p124_p2 = scmp.eq.s32.totalorder %s2230_s19, 3 }
   0x7   : > { %p129_p3 = scmp.ne.s32.totalorder %s2170_s16, %s2166_s15  ;;  %p130_p4 = scmp.eq.s32.totalorder %s1645_s20, 3 }
   0x8   : > { %s2245_s24 = scalar_select %p111_p1, %s2174_s17, %s113_s22  }
   0x9   : > { %p2247_p5 = por %p124_p2, %p123_p0  ;;  %p2251_p6 = por %p130_p4, %p129_p3 }
   0xa   : > { %p1648_p7 = scmp.ge.s32.totalorder %s2178_s18, 1  ;;  %p166_p8 = scmp.lt.s32.totalorder %s2178_s18, 5 }
   0xc   : > { %p167_p9 = pnand %p1648_p7, %p166_p8 }
   0xe   : > { %170 = sbr.rel (%p167_p9) target bundleno = 672 (0x2a0), region = 36 }
  0x15   : > { %v216_v0 = vld [vmem:[%s3560_s1 + $0x8] sm:$0xff]  ;;  %v218_v2 = vld [vmem:[%s3560_s1 + $0x18] sm:$0xff]  ;;  %v215_v5 = vld [vmem:[%s3560_s1] sm:$0xff]  ;;  %v2180_v7 = vmov 0.0   ;;  %s1650_s30 = sshll.u32 %s2230_s19, 4  ;;  %s189_s27 = sand.u32 1, %s2170_s16  }
  0x16   : > { %v220_v1 = vld [vmem:[%s3560_s1 + $0x28] sm:$0xff]  ;;  %v222_v4 = vld [vmem:[%s3560_s1 + $0x38] sm:$0xff]  ;;  %v219_v6 = vld [vmem:[%s3560_s1 + $0x20] sm:$0xff]  ;;  %365 = vmatprep.mubr.f32.mxu0 %v2180_v7  ;;  %526 = vmatprep.mubr.f32.mxu1 %v2180_v7  ;;  %p2412_p10 = scmp.lt.s32.totalorder %s1650_s30, 63  ;;  %s1657_s29 = sshll.u32 %s2230_s19, 11 }
  0x17   : > { %v1818_v3 = vpack.c.bf16 %v220_v1, %v216_v0  ;;  %v1850_v8 = vpack.c.bf16 %v222_v4, %v218_v2  ;;  %v1820_v9 = vpack.c.bf16 %v219_v6, %v215_v5  ;;  %v217_v10 = vld [vmem:[%s3560_s1 + $0x10] sm:$0xff]  ;;  %v224_v12 = vld [vmem:[%s3560_s1 + $0x48] sm:$0xff]  ;;  %v226_v15 = vld [vmem:[%s3560_s1 + $0x58] sm:$0xff]  ;;  %s3518_s8 = scalar_lea.sflag [#allocation3], %s189_s27 }
  0x18   : > { %v221_v11 = vld [vmem:[%s3560_s1 + $0x30] sm:$0xff]  ;;  %v228_v14 = vld [vmem:[%s3560_s1 + $0x68] sm:$0xff]  ;;  %v230_v16 = vld [vmem:[%s3560_s1 + $0x78] sm:$0xff]  ;;  %s3722_s30 = smov (!%p2412_p10, %s1650_s30), 63 }
  0x19   : > { %1819 = vmatprep.subr.bf16.mxu0 %v1818_v3  ;;  %v1852_v13 = vpack.c.bf16 %v221_v11, %v217_v10  ;;  %1851 = vmatprep.subr.bf16.mxu1 %v1850_v8  ;;  %v1822_v17 = vpack.c.bf16 %v228_v14, %v224_v12  ;;  %v1854_v18 = vpack.c.bf16 %v230_v16, %v226_v15  ;;  %v223_v19 = vld [vmem:[%s3560_s1 + $0x40] sm:$0xff]  ;;  %v225_v21 = vld [vmem:[%s3560_s1 + $0x50] sm:$0xff]  ;;  %v232_v24 = vld [vmem:[%s3560_s1 + $0x88] sm:$0xff]  ;;  %s1651_s14 = sshll.u32 %s3722_s30, 3  ;;  %s3511_s30 = scalar_lea.hbm %s3563_s4, %s1657_s29 }
  0x1a   : > { %1821 = vmatpush1.bf16.msra.mxu0 %v1820_v9  ;;  %v227_v20 = vld [vmem:[%s3560_s1 + $0x60] sm:$0xff]  ;;  %v229_v23 = vld [vmem:[%s3560_s1 + $0x70] sm:$0xff]  ;;  %v236_v25 = vld [vmem:[%s3560_s1 + $0xa8] sm:$0xff]  ;;  %s2477_s23 = scalar_lea.vmem %s3559_s0, %s1651_s14  ;;  %s1649_s14 = sshll.u32 %s189_s27, 7 }
  0x1b   : > { %1853 = vmatpush1.bf16.msra.mxu1 %v1852_v13  ;;  %v1824_v22 = vpack.c.bf16 %v227_v20, %v223_v19  ;;  %1823 = vmatprep.subr.bf16.mxu0 %v1822_v17  ;;  %v1856_v26 = vpack.c.bf16 %v229_v23, %v225_v21  ;;  %v1826_v27 = vpack.c.bf16 %v236_v25, %v232_v24  ;;  %v234_v28 = vld [vmem:[%s3560_s1 + $0x98] sm:$0xff]  ;;  %v231_v30 = vld [vmem:[%s3560_s1 + $0x80] sm:$0xff]  ;;  %v233_v33 = vld [vmem:[%s3560_s1 + $0x90] sm:$0xff]  ;;  %s3489_s28 = scalar_lea.vmem [#allocation2], %s1649_s14 }
  0x1c   : > { %1855 = vmatprep.subr.bf16.mxu1 %v1854_v18  ;;  %v238_v29 = vld [vmem:[%s3560_s1 + $0xb8] sm:$0xff]  ;;  %v235_v32 = vld [vmem:[%s3560_s1 + $0xa0] sm:$0xff]  ;;  %v237_v34 = vld [vmem:[%s3560_s1 + $0xb0] sm:$0xff]  ;;  %s1583_s5 = sshll.u32 %s3489_s28, 4  ;;  %s3513_s5 = int_to_ptr.vmem [resolvable:$true] %s1583_s5 }
  0x1d   : > { %v1858_v31 = vpack.c.bf16 %v238_v29, %v234_v28  ;;  %v1828_v35 = vpack.c.bf16 %v235_v32, %v231_v30  ;;  %v240_v36 = vld [vmem:[%s3560_s1 + $0xc8] sm:$0xff]  ;;  %v242_v38 = vld [vmem:[%s3560_s1 + $0xd8] sm:$0xff]  ;;  %v1860_v39 = vpack.c.bf16 %v237_v34, %v233_v33  ;;  %v239_v42 = vld [vmem:[%s3560_s1 + $0xc0] sm:$0xff]  ;;  %s2116_s19 = scalar_lea.vmem %s3513_s5, 2048 }
  0x1e   : > { %1825 = vmatpush1.bf16.msra.mxu0 %v1824_v22  ;;  %v244_v37 = vld [vmem:[%s3560_s1 + $0xe8] sm:$0xff]  ;;  %v246_v41 = vld [vmem:[%s3560_s1 + $0xf8] sm:$0xff]  ;;  %v243_v43 = vld [vmem:[%s3560_s1 + $0xe0] sm:$0xff]  ;;  %p2117_p11 = scmp.ne.s32.totalorder %s3513_s5, %s2116_s19 }
  0x1f   : > { %1857 = vmatpush1.bf16.msra.mxu1 %v1856_v26  ;;  %1827 = vmatprep.subr.bf16.mxu0 %v1826_v27  ;;  %v1830_v40 = vpack.c.bf16 %v244_v37, %v240_v36  ;;  %v1862_v44 = vpack.c.bf16 %v246_v41, %v242_v38  ;;  %v241_v45 = vld [vmem:[%s3560_s1 + $0xd0] sm:$0xff]  ;;  %v248_v47 = vld [vmem:[%s3560_s1 + $0x108] sm:$0xff]  ;;  %v250_v49 = vld [vmem:[%s3560_s1 + $0x118] sm:$0xff]  ;;  %v1832_v51 = vpack.c.bf16 %v243_v43, %v239_v42 }
  0x20   : > { %1859 = vmatprep.subr.bf16.mxu1 %v1858_v31  ;;  %v245_v46 = vld [vmem:[%s3560_s1 + $0xf0] sm:$0xff]  ;;  %v252_v48 = vld [vmem:[%s3560_s1 + $0x128] sm:$0xff]  ;;  %v254_v50 = vld [vmem:[%s3560_s1 + $0x138] sm:$0xff]  ;;  %p2118_p12 = pnand %p2117_p11, %p2247_p5 }
  0x21   : > { %v1864_v52 = vpack.c.bf16 %v245_v46, %v241_v45  ;;  %v1834_v53 = vpack.c.bf16 %v252_v48, %v248_v47  ;;  %v247_v54 = vld [vmem:[%s3560_s1 + $0x100] sm:$0xff]  ;;  %v249_v56 = vld [vmem:[%s3560_s1 + $0x110] sm:$0xff]  ;;  %v1866_v57 = vpack.c.bf16 %v254_v50, %v250_v49  ;;  %v256_v59 = vld [vmem:[%s3560_s1 + $0x148] sm:$0xff] }
  0x22   : > { %1829 = vmatpush1.bf16.msra.mxu0 %v1828_v35  ;;  %v251_v55 = vld [vmem:[%s3560_s1 + $0x120] sm:$0xff]  ;;  %v253_v58 = vld [vmem:[%s3560_s1 + $0x130] sm:$0xff]  ;;  %v260_v60 = vld [vmem:[%s3560_s1 + $0x168] sm:$0xff]  ;;  %p2119_p13 = pneg %p2118_p12 }
  0x23   : > { %1861 = vmatpush1.bf16.msra.mxu1 %v1860_v39  ;;  %1831 = vmatprep.subr.bf16.mxu0 %v1830_v40  ;;  %v258_v61 = vld [vmem:[%s3560_s1 + $0x158] sm:$0xff]  ;;  %v1836_v63 = vpack.c.bf16 %v251_v55, %v247_v54  ;;  %v1868_v0 = vpack.c.bf16 %v253_v58, %v249_v56  ;;  %v1838_v1 = vpack.c.bf16 %v260_v60, %v256_v59  ;;  %v255_v2 = vld [vmem:[%s3560_s1 + $0x140] sm:$0xff]  ;;  %v257_v4 = vld [vmem:[%s3560_s1 + $0x150] sm:$0xff] }
  0x24   : > { %1863 = vmatprep.subr.bf16.mxu1 %v1862_v44  ;;  %v262_v62 = vld [vmem:[%s3560_s1 + $0x178] sm:$0xff]  ;;  %v259_v3 = vld [vmem:[%s3560_s1 + $0x160] sm:$0xff]  ;;  %v261_v6 = vld [vmem:[%s3560_s1 + $0x170] sm:$0xff] }
  0x25   : > { %v1870_v5 = vpack.c.bf16 %v262_v62, %v258_v61  ;;  %v264_v8 = vld [vmem:[%s3560_s1 + $0x188] sm:$0xff]  ;;  %v266_v10 = vld [vmem:[%s3560_s1 + $0x198] sm:$0xff]  ;;  %v1840_v12 = vpack.c.bf16 %v259_v3, %v255_v2  ;;  %v1872_v13 = vpack.c.bf16 %v261_v6, %v257_v4  ;;  %v263_v15 = vld [vmem:[%s3560_s1 + $0x180] sm:$0xff] }
  0x26   : > { %1833 = vmatpush1.bf16.msra.mxu0 %v1832_v51  ;;  %v268_v9 = vld [vmem:[%s3560_s1 + $0x1a8] sm:$0xff]  ;;  %v270_v11 = vld [vmem:[%s3560_s1 + $0x1b8] sm:$0xff]  ;;  %v267_v16 = vld [vmem:[%s3560_s1 + $0x1a0] sm:$0xff] }
  0x27   : > { %1865 = vmatpush1.bf16.msra.mxu1 %v1864_v52  ;;  %1835 = vmatprep.subr.bf16.mxu0 %v1834_v53  ;;  %v1842_v14 = vpack.c.bf16 %v268_v9, %v264_v8  ;;  %v265_v17 = vld [vmem:[%s3560_s1 + $0x190] sm:$0xff]  ;;  %v1874_v18 = vpack.c.bf16 %v270_v11, %v266_v10  ;;  %v272_v20 = vld [vmem:[%s3560_s1 + $0x1c8] sm:$0xff]  ;;  %v274_v22 = vld [vmem:[%s3560_s1 + $0x1d8] sm:$0xff]  ;;  %v1844_v24 = vpack.c.bf16 %v267_v16, %v263_v15 }
  0x28   : > { %1867 = vmatprep.subr.bf16.mxu1 %v1866_v57  ;;  %v269_v19 = vld [vmem:[%s3560_s1 + $0x1b0] sm:$0xff]  ;;  %v276_v21 = vld [vmem:[%s3560_s1 + $0x1e8] sm:$0xff]  ;;  %v278_v23 = vld [vmem:[%s3560_s1 + $0x1f8] sm:$0xff] }
  0x29   : > { %v1876_v25 = vpack.c.bf16 %v269_v19, %v265_v17  ;;  %v1846_v26 = vpack.c.bf16 %v276_v21, %v272_v20  ;;  %v271_v27 = vld [vmem:[%s3560_s1 + $0x1c0] sm:$0xff]  ;;  %v1878_v29 = vpack.c.bf16 %v278_v23, %v274_v22  ;;  %v273_v30 = vld [vmem:[%s3560_s1 + $0x1d0] sm:$0xff]  ;;  %v1216_v33 = vld [vmem:[%s3562_s3 + $0x88] sm:$0xff] }
  0x2a   : > { %1837 = vmatpush1.bf16.msra.mxu0 %v1836_v63  ;;  %v275_v28 = vld [vmem:[%s3560_s1 + $0x1e0] sm:$0xff]  ;;  %v277_v31 = vld [vmem:[%s3560_s1 + $0x1f0] sm:$0xff]  ;;  %v1248_v35 = vld [vmem:[%s3562_s3 + $0x188] sm:$0xff] }
  0x2b   : > { %1869 = vmatpush1.bf16.msra.mxu1 %v1868_v0  ;;  %1839 = vmatprep.subr.bf16.mxu0 %v1838_v1  ;;  %v1215_v32 = vld [vmem:[%s3562_s3 + $0x80] sm:$0xff]  ;;  %v1848_v36 = vpack.c.bf16 %v275_v28, %v271_v27  ;;  %v1880_v37 = vpack.c.bf16 %v277_v31, %v273_v30  ;;  %v1200_v41 = vld [vmem:[%s3562_s3 + $0x8] sm:$0xff]  ;;  %v1217_v44 = vld [vmem:[%s3562_s3 + $0x90] sm:$0xff] }
  0x2c   : > { %1871 = vmatprep.subr.bf16.mxu1 %v1870_v5  ;;  %v1247_v34 = vld [vmem:[%s3562_s3 + $0x180] sm:$0xff]  ;;  %v1882_v38 = vpack.c.bf16 %v1216_v33, %v1215_v32  ;;  %v1232_v43 = vld [vmem:[%s3562_s3 + $0x108] sm:$0xff]  ;;  %v1218_v45 = vld [vmem:[%s3562_s3 + $0x98] sm:$0xff] }
  0x2d   : > { %v1914_v39 = vpack.c.bf16 %v1248_v35, %v1247_v34  ;;  %v1199_v40 = vld [vmem:[%s3562_s3] sm:$0xff]  ;;  %v1249_v47 = vld [vmem:[%s3562_s3 + $0x190] sm:$0xff]  ;;  %v1250_v48 = vld [vmem:[%s3562_s3 + $0x198] sm:$0xff]  ;;  %v1886_v51 = vpack.c.bf16 %v1218_v45, %v1217_v44 }
  0x2e   : > { %1841 = vmatpush1.bf16.msra.mxu0 %v1840_v12  ;;  %v1231_v42 = vld [vmem:[%s3562_s3 + $0x100] sm:$0xff]  ;;  %v1884_v49 = vpack.c.bf16 %v1200_v41, %v1199_v40  ;;  %v1201_v52 = vld [vmem:[%s3562_s3 + $0x10] sm:$0xff]  ;;  %v1202_v53 = vld [vmem:[%s3562_s3 + $0x18] sm:$0xff]  ;;  %v1918_v55 = vpack.c.bf16 %v1250_v48, %v1249_v47 }
  0x2f   : > { %1873 = vmatpush1.bf16.msra.mxu1 %v1872_v13  ;;  %1843 = vmatprep.subr.bf16.mxu0 %v1842_v14  ;;  %v199_v46 = vld [vmem:[%s2477_s23] sm:$0xff]  ;;  %v1916_v50 = vpack.c.bf16 %v1232_v43, %v1231_v42  ;;  %v1233_v54 = vld [vmem:[%s3562_s3 + $0x110] sm:$0xff]  ;;  %v1234_v56 = vld [vmem:[%s3562_s3 + $0x118] sm:$0xff]  ;;  %v1888_v62 = vpack.c.bf16 %v1202_v53, %v1201_v52 }
  0x30   : > { %1875 = vmatprep.subr.bf16.mxu1 %v1874_v18  ;;  %v1219_v57 = vld [vmem:[%s3562_s3 + $0xa0] sm:$0xff]  ;;  %v1220_v58 = vld [vmem:[%s3562_s3 + $0xa8] sm:$0xff]  ;;  %v1920_v63 = vpack.c.bf16 %v1234_v56, %v1233_v54  ;;  %v1221_v6 = vld [vmem:[%s3562_s3 + $0xb0] sm:$0xff] }
  0x31   : > { %v200_v59 = vld [vmem:[%s2477_s23 + $0x8] sm:$0xff]  ;;  %v1251_v60 = vld [vmem:[%s3562_s3 + $0x1a0] sm:$0xff]  ;;  %v1890_v0 = vpack.c.bf16 %v1220_v58, %v1219_v57  ;;  %v1222_v8 = vld [vmem:[%s3562_s3 + $0xb8] sm:$0xff] }
  0x32   : > { %1845 = vmatpush1.bf16.msra.mxu0 %v1844_v24  ;;  %v1252_v61 = vld [vmem:[%s3562_s3 + $0x1a8] sm:$0xff]  ;;  %v1203_v1 = vld [vmem:[%s3562_s3 + $0x20] sm:$0xff]  ;;  %v201_v9 = vld [vmem:[%s2477_s23 + $0x10] sm:$0xff]  ;;  %v1894_v14 = vpack.c.bf16 %v1222_v8, %v1221_v6 }
  0x33   : > { %1877 = vmatpush1.bf16.msra.mxu1 %v1876_v25  ;;  %1847 = vmatprep.subr.bf16.mxu0 %v1846_v26  ;;  %v1204_v2 = vld [vmem:[%s3562_s3 + $0x28] sm:$0xff]  ;;  %v1235_v3 = vld [vmem:[%s3562_s3 + $0x120] sm:$0xff]  ;;  %v1922_v4 = vpack.c.bf16 %v1252_v61, %v1251_v60  ;;  %v1253_v10 = vld [vmem:[%s3562_s3 + $0x1b0] sm:$0xff] }
  0x34   : > { %1879 = vmatprep.subr.bf16.mxu1 %v1878_v29  ;;  %v1236_v5 = vld [vmem:[%s3562_s3 + $0x128] sm:$0xff]  ;;  %v1254_v11 = vld [vmem:[%s3562_s3 + $0x1b8] sm:$0xff]  ;;  %v1892_v12 = vpack.c.bf16 %v1204_v2, %v1203_v1  ;;  %v1205_v15 = vld [vmem:[%s3562_s3 + $0x30] sm:$0xff] }
  0x35   : > { %v1924_v13 = vpack.c.bf16 %v1236_v5, %v1235_v3  ;;  %v1206_v16 = vld [vmem:[%s3562_s3 + $0x38] sm:$0xff]  ;;  %v1237_v17 = vld [vmem:[%s3562_s3 + $0x130] sm:$0xff]  ;;  %v1926_v18 = vpack.c.bf16 %v1254_v11, %v1253_v10  ;;  %v1223_v20 = vld [vmem:[%s3562_s3 + $0xc0] sm:$0xff] }
  0x36   : > { %1849 = vmatpush1.bf16.msra.mxu0 %v1848_v36  ;;  %v1238_v19 = vld [vmem:[%s3562_s3 + $0x138] sm:$0xff]  ;;  %v1224_v21 = vld [vmem:[%s3562_s3 + $0xc8] sm:$0xff]  ;;  %v1255_v23 = vld [vmem:[%s3562_s3 + $0x1c0] sm:$0xff]  ;;  %v1896_v25 = vpack.c.bf16 %v1206_v16, %v1205_v15 }
  0x37   : > { %1881 = vmatpush1.bf16.msra.mxu1 %v1880_v37  ;;  %1883 = vmatprep.subr.bf16.mxu0 %v1882_v38  ;;  %v202_v22 = vld [vmem:[%s2477_s23 + $0x18] sm:$0xff]  ;;  %v1256_v24 = vld [vmem:[%s3562_s3 + $0x1c8] sm:$0xff]  ;;  %v1928_v26 = vpack.c.bf16 %v1238_v19, %v1237_v17  ;;  %v1898_v27 = vpack.c.bf16 %v1224_v21, %v1223_v20  ;;  %v1207_v28 = vld [vmem:[%s3562_s3 + $0x40] sm:$0xff]  ;;  %v281_v19 = vlaneseq }
  0x38   : > { %1915 = vmatprep.subr.bf16.mxu1 %v1914_v39  ;;  %v1208_v29 = vld [vmem:[%s3562_s3 + $0x48] sm:$0xff]  ;;  %v1930_v30 = vpack.c.bf16 %v1256_v24, %v1255_v23  ;;  %v1239_v31 = vld [vmem:[%s3562_s3 + $0x140] sm:$0xff]  ;;  %v205_v37 = vld [vmem:[%s2477_s23 + $0x30] sm:$0xff] }
  0x39   : > { %366 = vmatmul.mubr.f32.vlgmr.msra.gmra.mrb[0].mxu0 %v199_v46  ;;  %v1240_v32 = vld [vmem:[%s3562_s3 + $0x148] sm:$0xff]  ;;  %v203_v33 = vld [vmem:[%s2477_s23 + $0x20] sm:$0xff]  ;;  %v1900_v34 = vpack.c.bf16 %v1208_v29, %v1207_v28  ;;  %v206_v38 = vld [vmem:[%s2477_s23 + $0x38] sm:$0xff]  ;;  %v282_v20 = vshrl.u32 %v281_v19, 7 }
  0x3a   : > { %527 = vmatmul.mubr.f32.vlgmr.msra.gmra.mrb[0].mxu1 %v199_v46  ;;  %371 = vmatprep.mubr.f32.mxu0 %v2180_v7  ;;  %v1932_v35 = vpack.c.bf16 %v1240_v32, %v1239_v31  ;;  %v204_v36 = vld [vmem:[%s2477_s23 + $0x28] sm:$0xff]  ;;  %v207_v39 = vld [vmem:[%s2477_s23 + $0x40] sm:$0xff]  ;;  %v209_v41 = vld [vmem:[%s2477_s23 + $0x50] sm:$0xff] }
  0x3b   : > { %532 = vmatprep.mubr.f32.mxu1 %v2180_v7  ;;  %1885 = vmatpush3.bf16.msra.mxu0 %v1884_v49  ;;  %v208_v40 = vld [vmem:[%s2477_s23 + $0x48] sm:$0xff]  ;;  %v210_v42 = vld [vmem:[%s2477_s23 + $0x58] sm:$0xff]  ;;  %v211_v43 = vld [vmem:[%s2477_s23 + $0x60] sm:$0xff]  ;;  %v283_v21 = vsub.s32 0, %v282_v20  ;;  %v291_v23 = vsub.s32 2, %v282_v20  ;;  %v287_v24 = vsub.s32 1, %v282_v20 }
  0x3c   : > { %1917 = vmatpush3.bf16.msra.mxu1 %v1916_v50  ;;  %1887 = vmatprep.subr.bf16.mxu0 %v1886_v51  ;;  %v212_v44 = vld [vmem:[%s2477_s23 + $0x68] sm:$0xff]  ;;  %v213_v45 = vld [vmem:[%s2477_s23 + $0x70] sm:$0xff]  ;;  %v214_v46 = vld [vmem:[%s2477_s23 + $0x78] sm:$0xff]  ;;  %s2181_s23 = smov [#allocation2]  }
  0x3d   : > { %372 = vmatmul.mubr.f32.gmra.mrb[2].mxu0 %v200_v59  ;;  %1919 = vmatprep.subr.bf16.mxu1 %v1918_v55  ;;  %v1225_v47 = vld [vmem:[%s3562_s3 + $0xd0] sm:$0xff]  ;;  %v1226_v48 = vld [vmem:[%s3562_s3 + $0xd8] sm:$0xff]  ;;  %v1227_v58 = vld [vmem:[%s3562_s3 + $0xe0] sm:$0xff]  ;;  %s2120_s9 = sshll.u32 %s2181_s23, 4  ;;  %s2121_s9 = int_to_ptr.vmem [resolvable:$false] %s2120_s9 }
  0x3e   : > { %533 = vmatmul.mubr.f32.gmra.mrb[2].mxu1 %v200_v59  ;;  %377 = vmatprep.mubr.f32.mxu0 %v2180_v7  ;;  %v1257_v49 = vld [vmem:[%s3562_s3 + $0x1d0] sm:$0xff]  ;;  %v1902_v50 = vpack.c.bf16 %v1226_v48, %v1225_v47  ;;  %v1258_v51 = vld [vmem:[%s3562_s3 + $0x1d8] sm:$0xff]  ;;  %v1228_v59 = vld [vmem:[%s3562_s3 + $0xe8] sm:$0xff]  ;;  %s2122_s10 = scalar_lea.vmem %s2121_s9, 4096  ;;  %p2123_p0 = scmp.lt.s32.totalorder %s3513_s5, %s2121_s9 }
  0x3f   : > { %538 = vmatprep.mubr.f32.mxu1 %v2180_v7  ;;  %1889 = vmatpush3.bf16.msra.mxu0 %v1888_v62  ;;  %v1210_v52 = vld [vmem:[%s3562_s3 + $0x58] sm:$0xff]  ;;  %v1934_v53 = vpack.c.bf16 %v1258_v51, %v1257_v49  ;;  %v1241_v55 = vld [vmem:[%s3562_s3 + $0x150] sm:$0xff]  ;;  %v1259_v60 = vld [vmem:[%s3562_s3 + $0x1e0] sm:$0xff]  ;;  %v1906_v61 = vpack.c.bf16 %v1228_v59, %v1227_v58  ;;  %p2124_p1 = scmp.lt.s32.totalorder %s2122_s10, %s2116_s19 }
  0x40   : > { %1921 = vmatpush3.bf16.msra.mxu1 %v1920_v63  ;;  %1891 = vmatprep.subr.bf16.mxu0 %v1890_v0  ;;  %v1242_v56 = vld [vmem:[%s3562_s3 + $0x158] sm:$0xff]  ;;  %v1260_v62 = vld [vmem:[%s3562_s3 + $0x1e8] sm:$0xff]  ;;  %v1211_v63 = vld [vmem:[%s3562_s3 + $0x60] sm:$0xff] }
  0x41   : > { %378 = vmatmul.mubr.f32.gmra.mrb[4].mxu0 %v201_v9  ;;  %1923 = vmatprep.subr.bf16.mxu1 %v1922_v4  ;;  %v1936_v57 = vpack.c.bf16 %v1242_v56, %v1241_v55  ;;  %v1212_v0 = vld [vmem:[%s3562_s3 + $0x68] sm:$0xff]  ;;  %v1938_v1 = vpack.c.bf16 %v1260_v62, %v1259_v60  ;;  %v1243_v3 = vld [vmem:[%s3562_s3 + $0x160] sm:$0xff]  ;;  %v1229_v6 = vld [vmem:[%s3562_s3 + $0xf0] sm:$0xff]  ;;  %p2125_p2 = por %p2124_p1, %p2123_p0 }
  0x42   : > { %539 = vmatmul.mubr.f32.gmra.mrb[4].mxu1 %v201_v9  ;;  %383 = vmatprep.mubr.f32.mxu0 %v2180_v7  ;;  %v1908_v2 = vpack.c.bf16 %v1212_v0, %v1211_v63  ;;  %v1244_v4 = vld [vmem:[%s3562_s3 + $0x168] sm:$0xff]  ;;  %v1230_v8 = vld [vmem:[%s3562_s3 + $0xf8] sm:$0xff]  ;;  %v1261_v9 = vld [vmem:[%s3562_s3 + $0x1f0] sm:$0xff] }
  0x43   : > { %544 = vmatprep.mubr.f32.mxu1 %v2180_v7  ;;  %1893 = vmatpush3.bf16.msra.mxu0 %v1892_v12  ;;  %v1940_v5 = vpack.c.bf16 %v1244_v4, %v1243_v3  ;;  %v1910_v10 = vpack.c.bf16 %v1230_v8, %v1229_v6  ;;  %v1262_v11 = vld [vmem:[%s3562_s3 + $0x1f8] sm:$0xff]  ;;  %v1213_v12 = vld [vmem:[%s3562_s3 + $0x70] sm:$0xff]  ;;  %p2126_p3 = pnand %p2125_p2, %p2119_p13 }
  0x44   : > { %1925 = vmatpush3.bf16.msra.mxu1 %v1924_v13  ;;  %1895 = vmatprep.subr.bf16.mxu0 %v1894_v14  ;;  %v1214_v13 = vld [vmem:[%s3562_s3 + $0x78] sm:$0xff]  ;;  %v1942_v14 = vpack.c.bf16 %v1262_v11, %v1261_v9  ;;  %v1245_v16 = vld [vmem:[%s3562_s3 + $0x170] sm:$0xff] }
  0x45   : > { %384 = vmatmul.mubr.f32.gmra.mrb[6].mxu0 %v202_v22  ;;  %1927 = vmatprep.subr.bf16.mxu1 %v1926_v18  ;;  %v1912_v15 = vpack.c.bf16 %v1214_v13, %v1213_v12  ;;  %v1246_v17 = vld [vmem:[%s3562_s3 + $0x178] sm:$0xff] }
  0x46   : > { %545 = vmatmul.mubr.f32.gmra.mrb[6].mxu1 %v202_v22  ;;  %389 = vmatprep.mubr.f32.mxu0 %v2180_v7  ;;  %v1944_v18 = vpack.c.bf16 %v1246_v17, %v1245_v16  ;;  %v279_v22 = vld [vmem:[%s3561_s2] sm:$0xf] }
  0x47   : > { %550 = vmatprep.mubr.f32.mxu1 %v2180_v7  ;;  %1897 = vmatpush3.bf16.msra.mxu0 %v1896_v25  ;;  %v2708_v25 = vrot.slane %v279_v22, %v283_v21  ;;  %v2712_v28 = vrot.slane %v279_v22, %v287_v24 }
  0x48   : > { %1929 = vmatpush3.bf16.msra.mxu1 %v1928_v26  ;;  %1899 = vmatprep.subr.bf16.mxu0 %v1898_v27  ;;  %v295_v26 = vsub.s32 3, %v282_v20  ;;  %v2710_v27 = vrot.slane %v279_v22, %v291_v23 }
  0x49   : > { %390 = vmatmul.mubr.f32.gmra.mrb[8].mxu0 %v203_v33  ;;  %1931 = vmatprep.subr.bf16.mxu1 %v1930_v30 }
  0x4a   : > { %551 = vmatmul.mubr.f32.gmra.mrb[8].mxu1 %v203_v33  ;;  %395 = vmatprep.mubr.f32.mxu0 %v2180_v7  ;;  %v2715_v33 = vrot.slane %v279_v22, %v295_v26 }
  0x4b   : > { %556 = vmatprep.mubr.f32.mxu1 %v2180_v7  ;;  %1901 = vmatpush3.bf16.msra.mxu0 %v1900_v34 }
  0x4c   : > { %1933 = vmatpush3.bf16.msra.mxu1 %v1932_v35  ;;  %1903 = vmatprep.subr.bf16.mxu0 %v1902_v50 }
  0x4d   : > { %396 = vmatmul.mubr.f32.gmra.mrb[10].mxu0 %v204_v36  ;;  %1935 = vmatprep.subr.bf16.mxu1 %v1934_v53 }
  0x4e   : > { %557 = vmatmul.mubr.f32.gmra.mrb[10].mxu1 %v204_v36  ;;  %401 = vmatprep.mubr.f32.mxu0 %v2180_v7 }
  0x4f   : > { %562 = vmatprep.mubr.f32.mxu1 %v2180_v7 }
  0x50   : > { %1937 = vmatpush3.bf16.msra.mxu1 %v1936_v57 }
  0x51   : > { %402 = vmatmul.mubr.f32.gmra.mrb[12].mxu0 %v205_v37  ;;  %1939 = vmatprep.subr.bf16.mxu1 %v1938_v1 }
  0x52   : > { %563 = vmatmul.mubr.f32.gmra.mrb[12].mxu1 %v205_v37  ;;  %407 = vmatprep.mubr.f32.mxu0 %v2180_v7 }
  0x53   : > { %568 = vmatprep.mubr.f32.mxu1 %v2180_v7 }
  0x54   : > { %1941 = vmatpush3.bf16.msra.mxu1 %v1940_v5 }
  0x55   : > { %408 = vmatmul.mubr.f32.gmra.mrb[14].mxu0 %v206_v38  ;;  %1943 = vmatprep.subr.bf16.mxu1 %v1942_v14 }
  0x56   : > { %569 = vmatmul.mubr.f32.gmra.mrb[14].mxu1 %v206_v38  ;;  %413 = vmatprep.mubr.f32.mxu0 %v2180_v7 }
  0x57   : > { %574 = vmatprep.mubr.f32.mxu1 %v2180_v7 }
  0x58   : > { %1945 = vmatpush3.bf16.msra.mxu1 %v1944_v18 }
  0x59   : > { %414 = vmatmul.mubr.f32.gmra.mrb[16].mxu0 %v207_v39 }
  0x5a   : > { %575 = vmatmul.mubr.f32.gmra.mrb[16].mxu1 %v207_v39  ;;  %419 = vmatprep.mubr.f32.mxu0 %v2180_v7 }
  0x5b   : > { %580 = vmatprep.mubr.f32.mxu1 %v2180_v7 }
  0x5d   : > { %420 = vmatmul.mubr.f32.gmra.mrb[18].mxu0 %v208_v40 }
  0x5e   : > { %581 = vmatmul.mubr.f32.gmra.mrb[18].mxu1 %v208_v40  ;;  %425 = vmatprep.mubr.f32.mxu0 %v2180_v7 }
  0x5f   : > { %586 = vmatprep.mubr.f32.mxu1 %v2180_v7 }
  0x61   : > { %426 = vmatmul.mubr.f32.gmra.mrb[20].mxu0 %v209_v41 }
  0x62   : > { %587 = vmatmul.mubr.f32.gmra.mrb[20].mxu1 %v209_v41  ;;  %431 = vmatprep.mubr.f32.mxu0 %v2180_v7 }
  0x63   : > { %592 = vmatprep.mubr.f32.mxu1 %v2180_v7 }
  0x65   : > { %432 = vmatmul.mubr.f32.gmra.mrb[22].mxu0 %v210_v42 }
  0x66   : > { %593 = vmatmul.mubr.f32.gmra.mrb[22].mxu1 %v210_v42  ;;  %437 = vmatprep.mubr.f32.mxu0 %v2180_v7 }
  0x67   : > { %598 = vmatprep.mubr.f32.mxu1 %v2180_v7 }
  0x69   : > { %438 = vmatmul.mubr.f32.gmra.mrb[24].mxu0 %v211_v43 }
  0x6a   : > { %599 = vmatmul.mubr.f32.gmra.mrb[24].mxu1 %v211_v43  ;;  %443 = vmatprep.mubr.f32.mxu0 %v2180_v7 }
  0x6b   : > { %604 = vmatprep.mubr.f32.mxu1 %v2180_v7 }
  0x6d   : > { %444 = vmatmul.mubr.f32.gmra.mrb[26].mxu0 %v212_v44 }
  0x6e   : > { %605 = vmatmul.mubr.f32.gmra.mrb[26].mxu1 %v212_v44  ;;  %449 = vmatprep.mubr.f32.mxu0 %v2180_v7 }
  0x6f   : > { %610 = vmatprep.mubr.f32.mxu1 %v2180_v7 }
  0x71   : > { %450 = vmatmul.mubr.f32.gmra.mrb[28].mxu0 %v213_v45 }
  0x72   : > { %611 = vmatmul.mubr.f32.gmra.mrb[28].mxu1 %v213_v45  ;;  %455 = vmatprep.mubr.f32.mxu0 %v2180_v7 }
  0x73   : > { %616 = vmatprep.mubr.f32.mxu1 %v2180_v7  ;;  %v1209_v7 = vld [vmem:[%s3562_s3 + $0x50] sm:$0xff] }
  0x74   : > { %v1904_v54 = vpack.c.bf16 %v1210_v52, %v1209_v7 }
  0x75   : > { %456 = vmatmul.mubr.f32.gmra.mrb[30].mxu0 %v214_v46 }
  0x76   : > { %617 = vmatmul.mubr.f32.gmra.mrb[30].mxu1 %v214_v46  ;;  %1905 = vmatpush3.bf16.msra.mxu0 %v1904_v54 }
  0x77   : > { %1907 = vmatprep.subr.bf16.mxu0 %v1906_v61 }
  0x7a   : > { %1909 = vmatpush3.bf16.msra.mxu0 %v1908_v2 }
  0x7b   : > { %1911 = vmatprep.subr.bf16.mxu0 %v1910_v10 }
  0x7e   : > { %1913 = vmatpush3.bf16.msra.mxu0 %v1912_v15 }
 0x10c   : > { %v367_v29 = vpop.f32.mrb[0].mxu0 }
 0x10d   : > { %v368_v30 = vadd.f32 %v367_v29, %v2708_v25  ;;  %v528_v31 = vpop.f32.mrb[0].mxu1  ;;  %v369_v32 = vpop.f32.mrb[1].mxu0 }
 0x10e   : > { %v529_v34 = vadd.f32 %v528_v31, %v2710_v27  ;;  %v370_v35 = vadd.f32 %v369_v32, %v2712_v28  ;;  %v530_v36 = vpop.f32.mrb[1].mxu1 }
 0x10f   : > { %v687_v37 = vmul.f32 0.044715, %v368_v30  ;;  %v2720_v42 = vadd.f32 %v530_v36, %v2715_v33  ;;  %v2739_v61 = vmul.f32 0.5, %v368_v30 }
 0x110   : > { %v689_v38 = vmul.f32 0.044715, %v529_v34  ;;  %v688_v39 = vmul.f32 0.044715, %v370_v35  ;;  %v373_v40 = vpop.f32.mrb[2].mxu0  ;;  %v2745_v3 = vmul.f32 0.5, %v529_v34 }
 0x111   : > { %v751_v41 = vmul.f32 %v687_v37, %v368_v30  ;;  %v2723_v43 = vadd.f32 %v373_v40, %v2708_v25  ;;  %v534_v44 = vpop.f32.mrb[2].mxu1  ;;  %v375_v45 = vpop.f32.mrb[3].mxu0  ;;  %v690_v56 = vmul.f32 0.044715, %v2720_v42  ;;  %v2750_v5 = vmul.f32 0.5, %v370_v35 }
 0x112   : > { %v753_v46 = vmul.f32 %v689_v38, %v529_v34  ;;  %v752_v47 = vmul.f32 %v688_v39, %v370_v35  ;;  %v2726_v48 = vadd.f32 %v534_v44, %v2710_v27  ;;  %v536_v49 = vpop.f32.mrb[3].mxu1  ;;  %v2729_v7 = vadd.f32 %v375_v45, %v2712_v28 }
 0x113   : > { %v815_v50 = vmul.f32 %v751_v41, %v368_v30  ;;  %v2732_v52 = vadd.f32 %v536_v49, %v2715_v33  ;;  %v691_v57 = vmul.f32 0.044715, %v2723_v43  ;;  %v754_v12 = vmul.f32 %v690_v56, %v2720_v42 }
 0x114   : > { %v817_v51 = vmul.f32 %v753_v46, %v529_v34  ;;  %v379_v53 = vpop.f32.mrb[4].mxu0  ;;  %v816_v54 = vmul.f32 %v752_v47, %v370_v35  ;;  %v693_v63 = vmul.f32 0.044715, %v2726_v48  ;;  %v692_v6 = vmul.f32 0.044715, %v2729_v7 }
 0x115   : > { %v879_v55 = vadd.f32 %v815_v50, %v368_v30  ;;  %v2737_v58 = vadd.f32 %v379_v53, %v2708_v25  ;;  %v540_v59 = vpop.f32.mrb[4].mxu1  ;;  %v381_v60 = vpop.f32.mrb[5].mxu0  ;;  %v694_v8 = vmul.f32 0.044715, %v2732_v52  ;;  %v2759_v13 = vmul.f32 %v691_v57, %v2723_v43 }
 0x116   : > { %v881_v62 = vadd.f32 %v817_v51, %v529_v34  ;;  %v2743_v0 = vadd.f32 %v540_v59, %v2710_v27  ;;  %v542_v1 = vpop.f32.mrb[5].mxu1  ;;  %v2748_v4 = vadd.f32 %v381_v60, %v2712_v28  ;;  %v880_v11 = vadd.f32 %v816_v54, %v370_v35 }
 0x117   : > { %v943_v2 = vmul.f32 0.7978846, %v879_v55  ;;  %v2755_v9 = vadd.f32 %v542_v1, %v2715_v33  ;;  %v695_v14 = vmul.f32 0.044715, %v2737_v58  ;;  %v2766_v19 = vmul.f32 %v693_v63, %v2726_v48 }
 0x118   : > { %v385_v10 = vpop.f32.mrb[6].mxu0  ;;  %v945_v18 = vmul.f32 0.7978846, %v881_v62  ;;  %v697_v20 = vmul.f32 0.044715, %v2743_v0  ;;  %v756_v29 = vmul.f32 %v692_v6, %v2729_v7  ;;  %v2781_v30 = vmul.f32 %v694_v8, %v2732_v52 }
 0x119   : > { %v2763_v15 = vadd.f32 %v385_v10, %v2708_v25  ;;  %v546_v16 = vpop.f32.mrb[6].mxu1  ;;  %v387_v17 = vpop.f32.mrb[7].mxu0  ;;  %1988 = vtanh.f32 %v943_v2  ;;  %v696_v23 = vmul.f32 0.044715, %v2748_v4  ;;  %v698_v31 = vmul.f32 0.044715, %v2755_v9 }
 0x11a   : > { %v2770_v21 = vadd.f32 %v546_v16, %v2710_v27  ;;  %v548_v22 = vpop.f32.mrb[7].mxu1  ;;  %v2774_v24 = vadd.f32 %v387_v17, %v2712_v28  ;;  %v944_v34 = vmul.f32 0.7978846, %v880_v11  ;;  %v2785_v35 = vmul.f32 %v695_v14, %v2737_v58 }
 0x11b   : > { %v2777_v26 = vadd.f32 %v548_v22, %v2715_v33  ;;  %v699_v36 = vmul.f32 0.044715, %v2763_v15  ;;  %v2800_v47 = vmul.f32 %v697_v20, %v2743_v0  ;;  %v2807_v51 = vmul.f32 %v696_v23, %v2748_v4 }
 0x11c   : > { %v391_v32 = vpop.f32.mrb[8].mxu0  ;;  %v701_v37 = vmul.f32 0.044715, %v2770_v21  ;;  %v700_v41 = vmul.f32 0.044715, %v2774_v24  ;;  %1990 = vtanh.f32 %v944_v34  ;;  %v2810_v53 = vmul.f32 %v698_v31, %v2755_v9 }
 0x11d   : > { %v2790_v38 = vadd.f32 %v391_v32, %v2708_v25  ;;  %v552_v39 = vpop.f32.mrb[8].mxu1  ;;  %v393_v40 = vpop.f32.mrb[9].mxu0  ;;  %1992 = vtanh.f32 %v945_v18  ;;  %v702_v49 = vmul.f32 0.044715, %v2777_v26  ;;  %v2813_v55 = vmul.f32 0.5, %v2720_v42 }
 0x11e   : > { %v2794_v44 = vadd.f32 %v552_v39, %v2710_v27  ;;  %v2797_v45 = vadd.f32 %v393_v40, %v2712_v28  ;;  %v554_v46 = vpop.f32.mrb[9].mxu1  ;;  %v818_v56 = vmul.f32 %v754_v12, %v2720_v42  ;;  %v2817_v57 = vmul.f32 %v699_v36, %v2763_v15 }
 0x11f   : > { %3615 = vst [vmem:[#allocation5_spill] sm:$0xff] %v2790_v38  ;;  %v2804_v50 = vadd.f32 %v554_v46, %v2715_v33  ;;  %v2820_v59 = vmul.f32 %v701_v37, %v2770_v21  ;;  %v703_v60 = vmul.f32 0.044715, %v2790_v38  ;;  %v2827_v2 = vmul.f32 %v700_v41, %v2774_v24 }
 0x120   : > { %3616 = vst [vmem:[#allocation6_spill] sm:$0xff] %v2794_v44  ;;  %v397_v54 = vpop.f32.mrb[10].mxu0  ;;  %v705_v6 = vmul.f32 0.044715, %v2794_v44  ;;  %v704_v8 = vmul.f32 0.044715, %v2797_v45  ;;  %v2835_v12 = vmul.f32 %v702_v49, %v2777_v26  ;;  %v882_v17 = vadd.f32 %v818_v56, %v2720_v42 }
 0x121   : > { %v2824_v62 = vadd.f32 %v397_v54, %v2708_v25  ;;  %v558_v63 = vpop.f32.mrb[10].mxu1  ;;  %v399_v1 = vpop.f32.mrb[11].mxu0  ;;  %v706_v14 = vmul.f32 0.044715, %v2804_v50  ;;  %v2847_v23 = vmul.f32 0.5, %v2729_v7  ;;  %v820_v31 = vmul.f32 %v756_v29, %v2729_v7 }
 0x122   : > { %v2832_v10 = vadd.f32 %v558_v63, %v2710_v27  ;;  %v560_v11 = vpop.f32.mrb[11].mxu1  ;;  %v2839_v16 = vadd.f32 %v399_v1, %v2712_v28  ;;  %v2851_v34 = vmul.f32 %v703_v60, %v2790_v38  ;;  %v946_v40 = vmul.f32 0.7978846, %v882_v17 }
 0x123   : > { %3617 = vst [vmem:[#allocation7_spill] sm:$0xff] %v2824_v62  ;;  %v707_v18 = vmul.f32 0.044715, %v2824_v62  ;;  %v2844_v20 = vadd.f32 %v560_v11, %v2715_v33  ;;  %v1989_v32 = vpop.eup %1988  ;;  %v2858_v41 = vmul.f32 %v705_v6, %v2794_v44  ;;  %v2861_v46 = vmul.f32 %v704_v8, %v2797_v45 }
 0x124   : > { %3618 = vst [vmem:[#allocation8_spill] sm:$0xff] %v2832_v10  ;;  %3619 = vst [vmem:[#allocation9_spill] sm:$0xff] %v2839_v16  ;;  %v403_v22 = vpop.f32.mrb[12].mxu0  ;;  %v709_v36 = vmul.f32 0.044715, %v2832_v10  ;;  %v2870_v56 = vmul.f32 %v706_v14, %v2804_v50  ;;  %1994 = vtanh.f32 %v946_v40  ;;  %v1071_v17 = vadd.f32 1.0, %v1989_v32 }
 0x125   : > { %3620 = vst [vmem:[#allocation10_spill] sm:$0xff] %v2851_v34  ;;  %v2855_v37 = vadd.f32 %v403_v22, %v2708_v25  ;;  %v564_v42 = vpop.f32.mrb[12].mxu1  ;;  %v405_v39 = vpop.f32.mrb[13].mxu0  ;;  %3621 = vst [vmem:[#allocation11_spill] sm:$0xff] %v2858_v41  ;;  %v708_v60 = vmul.f32 0.044715, %v2839_v16  ;;  %v2877_v6 = vmul.f32 %v707_v18, %v2824_v62  ;;  %v884_v22 = vadd.f32 %v820_v31, %v2729_v7 }
 0x126   : > { %v2864_v29 = vadd.f32 %v564_v42, %v2710_v27  ;;  %v2867_v49 = vadd.f32 %v405_v39, %v2712_v28  ;;  %v566_v54 = vpop.f32.mrb[13].mxu1  ;;  %3623 = vst [vmem:[#allocation13_spill] sm:$0xff] %v2870_v56  ;;  %v1991_v1 = vpop.eup %1990  ;;  %v710_v8 = vmul.f32 0.044715, %v2844_v20  ;;  %v2882_v14 = vmul.f32 %v709_v36, %v2832_v10 }
 0x127   : > { %v2874_v63 = vadd.f32 %v566_v54, %v2715_v33  ;;  %3624 = vst [vmem:[#allocation14_spill] sm:$0xff] %v2877_v6  ;;  %v1993_v42 = vpop.eup %1992  ;;  %v711_v39 = vmul.f32 0.044715, %v2855_v37  ;;  %v1072_v44 = vadd.f32 1.0, %v1991_v1  ;;  %v2897_v36 = vmul.f32 %v708_v60, %v2839_v16 }
 0x128   : > { %3622 = vst [vmem:[#allocation12_spill] sm:$0xff] %v2864_v29  ;;  %v409_v11 = vpop.f32.mrb[14].mxu0  ;;  %3625 = vst [vmem:[#allocation15_spill] sm:$0xff] %v2882_v14  ;;  %v713_v18 = vmul.f32 0.044715, %v2864_v29  ;;  %v1073_v34 = vadd.f32 1.0, %v1993_v42  ;;  %v2908_v38 = vmul.f32 %v710_v8, %v2844_v20 }
 0x129   : > { %v2886_v54 = vadd.f32 %v409_v11, %v2708_v25  ;;  %v570_v40 = vpop.f32.mrb[14].mxu1  ;;  %v411_v41 = vpop.f32.mrb[15].mxu0  ;;  %v712_v6 = vmul.f32 0.044715, %v2867_v49  ;;  %3628 = vst [vmem:[#allocation18_spill] sm:$0xff] %v2897_v36  ;;  %v1136_v1 = vmul.f32 %v1072_v44, %v2750_v5  ;;  %v2911_v60 = vmul.f32 %v711_v39, %v2855_v37 }
 0x12a   : > { %v2891_v32 = vadd.f32 %v570_v40, %v2710_v27  ;;  %v2894_v7 = vadd.f32 %v411_v41, %v2712_v28  ;;  %v572_v31 = vpop.f32.mrb[15].mxu1  ;;  %v714_v11 = vmul.f32 0.044715, %v2874_v63  ;;  %v1135_v40 = vmul.f32 %v1071_v17, %v2739_v61 }
 0x12b   : > { %3626 = vst [vmem:[#allocation16_spill] sm:$0xff] %v2886_v54  ;;  %v2901_v14 = vadd.f32 %v572_v31, %v2715_v33  ;;  %v715_v10 = vmul.f32 0.044715, %v2886_v54  ;;  %1327 = vmatprep.mubr.f32.mxu0 %v1136_v1  ;;  %v948_v5 = vmul.f32 0.7978846, %v884_v22  ;;  %v2915_v44 = vmul.f32 %v713_v18, %v2864_v29 }
 0x12c   : > { %3627 = vst [vmem:[#allocation17_spill] sm:$0xff] %v2891_v32  ;;  %v717_v62 = vmul.f32 0.044715, %v2891_v32  ;;  %v415_v41 = vpop.f32.mrb[16].mxu0  ;;  %v716_v36 = vmul.f32 0.044715, %v2894_v7  ;;  %v2918_v56 = vmul.f32 %v712_v6, %v2867_v49  ;;  %1328 = vmatmul.mubr.f32.vlgmr.msra.gmra.mrb[32].mxu0 %v1135_v40  ;;  %v2925_v42 = vmul.f32 %v714_v11, %v2874_v63 }
 0x12d   : > { %3629 = vst [vmem:[#allocation19_spill] sm:$0xff] %v2901_v14  ;;  %v576_v31 = vpop.f32.mrb[16].mxu1  ;;  %v417_v16 = vpop.f32.mrb[17].mxu0  ;;  %3630 = vst [vmem:[#allocation20_spill] sm:$0xff] %v2915_v44  ;;  %v718_v61 = vmul.f32 0.044715, %v2901_v14  ;;  %v2922_v8 = vadd.f32 %v415_v41, %v2708_v25  ;;  %1996 = vtanh.f32 %v948_v5  ;;  %v1137_v6 = vmul.f32 %v1073_v34, %v2745_v3 }
 0x12e   : > { %v578_v17 = vpop.f32.mrb[17].mxu1  ;;  %v2928_v39 = vadd.f32 %v576_v31, %v2710_v27  ;;  %v2931_v22 = vadd.f32 %v417_v16, %v2712_v28  ;;  %v2938_v1 = vmul.f32 0.5, %v2732_v52  ;;  %v822_v40 = vmul.f32 %v2781_v30, %v2732_v52  ;;  %v1995_v41 = vpop.eup %1994 }
 0x12f   : > { %3631 = vst [vmem:[#allocation21_spill] sm:$0xff] %v2922_v8  ;;  %v2935_v18 = vadd.f32 %v578_v17, %v2715_v33  ;;  %v2943_v31 = vmul.f32 %v715_v10, %v2886_v54  ;;  %v2946_v16 = vmul.f32 %v717_v62, %v2891_v32  ;;  %v2949_v5 = vmul.f32 %v716_v36, %v2894_v7 }
 0x130   : > { %3632 = vst [vmem:[#allocation22_spill] sm:$0xff] %v2928_v39  ;;  %v421_v11 = vpop.f32.mrb[18].mxu0  ;;  %v819_v3 = vmul.f32 %v2759_v13, %v2723_v43  ;;  %v2954_v44 = vmul.f32 %v718_v61, %v2901_v14  ;;  %v1074_v30 = vadd.f32 1.0, %v1995_v41  ;;  %v719_v29 = vmul.f32 0.044715, %v2922_v8 }
 0x131   : > { %3633 = vst [vmem:[#allocation23_spill] sm:$0xff] %v2935_v18  ;;  %3634 = vst [vmem:[#allocation24_spill] sm:$0xff] %v2943_v31  ;;  %v582_v34 = vpop.f32.mrb[18].mxu1  ;;  %v423_v17 = vpop.f32.mrb[19].mxu0  ;;  %v886_v10 = vadd.f32 %v822_v40, %v2732_v52  ;;  %v721_v62 = vmul.f32 0.044715, %v2928_v39  ;;  %v821_v13 = vmul.f32 %v2766_v19, %v2726_v48  ;;  %v2966_v41 = vadd.f32 %v421_v11, %v2708_v25 }
 0x132   : > { %3635 = vst [vmem:[#allocation25_spill] sm:$0xff] %v2946_v16  ;;  %3636 = vst [vmem:[#allocation26_spill] sm:$0xff] %v2949_v5  ;;  %v584_v31 = vpop.f32.mrb[19].mxu1  ;;  %v720_v16 = vmul.f32 0.044715, %v2931_v22  ;;  %v883_v36 = vadd.f32 %v819_v3, %v2723_v43  ;;  %v1138_v32 = vmul.f32 %v1074_v30, %v2813_v55  ;;  %v2970_v14 = vadd.f32 %v582_v34, %v2710_v27 }
 0x133   : > { %3637 = vst [vmem:[#allocation27_spill] sm:$0xff] %v2954_v44  ;;  %v722_v61 = vmul.f32 0.044715, %v2935_v18  ;;  %v950_v54 = vmul.f32 0.7978846, %v886_v10  ;;  %3638 = vst [vmem:[#allocation28_spill] sm:$0xff] %v2966_v41  ;;  %v885_v40 = vadd.f32 %v821_v13, %v2726_v48  ;;  %v2973_v3 = vadd.f32 %v423_v17, %v2712_v28 }
 0x134   : > { %v427_v44 = vpop.f32.mrb[20].mxu0  ;;  %v947_v52 = vmul.f32 0.7978846, %v883_v36  ;;  %3639 = vst [vmem:[#allocation29_spill] sm:$0xff] %v2970_v14  ;;  %1472 = vmatprep.mubr.f32.mxu1 %v1138_v32  ;;  %v2976_v55 = vmul.f32 %v719_v29, %v2922_v8  ;;  %v2979_v11 = vmul.f32 0.5, %v2723_v43  ;;  %v2982_v30 = vmul.f32 0.5, %v2726_v48 }
 0x135   : > { %3640 = vst [vmem:[#allocation30_spill] sm:$0xff] %v2973_v3  ;;  %v588_v5 = vpop.f32.mrb[20].mxu1  ;;  %v429_v19 = vpop.f32.mrb[21].mxu0  ;;  %1998 = vtanh.f32 %v950_v54  ;;  %1473 = vmatmul.mubr.f32.vlgmr.msra.gmra.mrb[32].mxu1 %v1137_v6  ;;  %v2985_v34 = vmul.f32 %v721_v62, %v2928_v39  ;;  %v949_v17 = vmul.f32 0.7978846, %v885_v40  ;;  %v2988_v36 = vadd.f32 %v584_v31, %v2715_v33 }
 0x136   : > { %3641 = vst [vmem:[#allocation31_spill] sm:$0xff] %v2976_v55  ;;  %v590_v10 = vpop.f32.mrb[21].mxu1  ;;  %2000 = vtanh.f32 %v947_v52  ;;  %v2991_v29 = vmul.f32 %v720_v16, %v2931_v22  ;;  %v2994_v54 = vmul.f32 %v722_v61, %v2935_v18  ;;  %v723_v43 = vmul.f32 0.044715, %v2966_v41 }
 0x137   : > { %3642 = vst [vmem:[#allocation32_spill] sm:$0xff] %v2985_v34  ;;  %3643 = vst [vmem:[#allocation33_spill] sm:$0xff] %v2988_v36  ;;  %v824_v48 = vmul.f32 %v2807_v51, %v2748_v4  ;;  %v1997_v6 = vpop.eup %1996  ;;  %2002 = vtanh.f32 %v949_v17  ;;  %v725_v62 = vmul.f32 0.044715, %v2970_v14  ;;  %v724_v31 = vmul.f32 0.044715, %v2973_v3 }
 0x138   : > { %3644 = vst [vmem:[#allocation34_spill] sm:$0xff] %v2994_v54  ;;  %v2999_v32 = vpop.f32.mrb[22].mxu0  ;;  %v826_v16 = vmul.f32 %v2810_v53, %v2755_v9  ;;  %v1076_v52 = vadd.f32 1.0, %v1997_v6  ;;  %v3010_v40 = vmul.f32 0.5, %v2748_v4  ;;  %v823_v17 = vmul.f32 %v2785_v35, %v2737_v58 }
 0x139   : > { %v3005_v13 = vpop.f32.mrb[22].mxu1  ;;  %v3007_v61 = vpop.f32.mrb[23].mxu0  ;;  %v888_v51 = vadd.f32 %v824_v48, %v2748_v4  ;;  %v726_v39 = vmul.f32 0.044715, %v2988_v36  ;;  %v825_v53 = vmul.f32 %v2800_v47, %v2743_v0  ;;  %v3022_v8 = vadd.f32 %v427_v44, %v2708_v25 }
 0x13a   : > { %v3015_v34 = vpop.f32.mrb[23].mxu1  ;;  %v890_v55 = vadd.f32 %v826_v16, %v2755_v9  ;;  %v1140_v6 = vmul.f32 %v1076_v52, %v2847_v23  ;;  %v887_v4 = vadd.f32 %v823_v17, %v2737_v58  ;;  %v3027_v48 = vadd.f32 %v588_v5, %v2710_v27 }
 0x13b   : > { %3645 = vst [vmem:[#allocation35_spill] sm:$0xff] %v3022_v8  ;;  %v952_v54 = vmul.f32 0.7978846, %v888_v51  ;;  %v3032_v18 = vmul.f32 %v723_v43, %v2966_v41  ;;  %v3035_v16 = vmul.f32 %v725_v62, %v2970_v14  ;;  %v889_v44 = vadd.f32 %v825_v53, %v2743_v0 }
 0x13c   : > { %3646 = vst [vmem:[#allocation36_spill] sm:$0xff] %v3027_v48  ;;  %v3029_v35 = vpop.f32.mrb[24].mxu0  ;;  %v954_v47 = vmul.f32 0.7978846, %v890_v55  ;;  %1332 = vmatprep.mubr.f32.mxu0 %v1140_v6  ;;  %v3039_v23 = vmul.f32 %v724_v31, %v2973_v3  ;;  %v951_v52 = vmul.f32 0.7978846, %v887_v4  ;;  %v3042_v5 = vadd.f32 %v429_v19, %v2712_v28 }
 0x13d   : > { %3647 = vst [vmem:[#allocation37_spill] sm:$0xff] %v3032_v18  ;;  %3648 = vst [vmem:[#allocation38_spill] sm:$0xff] %v3035_v16  ;;  %2004 = vtanh.f32 %v952_v54  ;;  %v3044_v51 = vpop.f32.mrb[24].mxu1  ;;  %v3046_v17 = vpop.f32.mrb[25].mxu0  ;;  %v3049_v43 = vmul.f32 0.5, %v2755_v9  ;;  %v3055_v54 = vmul.f32 %v726_v39, %v2988_v36  ;;  %v3058_v19 = vmul.f32 0.5, %v2737_v58 }
 0x13e   : > { %3649 = vst [vmem:[#allocation39_spill] sm:$0xff] %v3039_v23  ;;  %2006 = vtanh.f32 %v954_v47  ;;  %v953_v55 = vmul.f32 0.7978846, %v889_v44  ;;  %v727_v62 = vmul.f32 0.044715, %v3022_v8  ;;  %v3052_v53 = vpop.f32.mrb[25].mxu1  ;;  %v3064_v47 = vadd.f32 %v590_v10, %v2715_v33 }
 0x13f   : > { %v1999_v31 = vpop.eup %1998  ;;  %3650 = vst [vmem:[#allocation40_spill] sm:$0xff] %v3055_v54  ;;  %2008 = vtanh.f32 %v951_v52  ;;  %v729_v6 = vmul.f32 0.044715, %v3027_v48  ;;  %v828_v44 = vmul.f32 %v2827_v2, %v2774_v24  ;;  %v3073_v52 = vmul.f32 0.5, %v2743_v0 }
 0x140   : > { %v3061_v4 = vpop.f32.mrb[26].mxu0  ;;  %v2001_v9 = vpop.eup %2000  ;;  %v1078_v16 = vadd.f32 1.0, %v1999_v31  ;;  %2010 = vtanh.f32 %v953_v55  ;;  %3651 = vst [vmem:[#allocation41_spill] sm:$0xff] %v3064_v47  ;;  %v728_v18 = vmul.f32 0.044715, %v3042_v5  ;;  %v830_v31 = vmul.f32 %v2835_v12, %v2777_v26 }
 0x141   : > { %v3068_v14 = vpop.f32.mrb[26].mxu1  ;;  %v3070_v39 = vpop.f32.mrb[27].mxu0  ;;  %v1075_v58 = vadd.f32 1.0, %v2001_v9  ;;  %v3082_v2 = vmul.f32 %v727_v62, %v3022_v8  ;;  %v892_v54 = vadd.f32 %v828_v44, %v2774_v24  ;;  %v827_v9 = vmul.f32 %v2817_v57, %v2763_v15 }
 0x142   : > { %v3078_v55 = vpop.f32.mrb[27].mxu1  ;;  %v2003_v10 = vpop.eup %2002  ;;  %v1142_v41 = vmul.f32 %v1078_v16, %v2938_v1  ;;  %v894_v23 = vadd.f32 %v830_v31, %v2777_v26  ;;  %v829_v12 = vmul.f32 %v2820_v59, %v2770_v21  ;;  %v3094_v1 = vmul.f32 %v729_v6, %v3027_v48 }
 0x143   : > { %3652 = vst [vmem:[#allocation42_spill] sm:$0xff] %v3082_v2  ;;  %v1139_v0 = vmul.f32 %v1075_v58, %v2979_v11  ;;  %v1077_v36 = vadd.f32 1.0, %v2003_v10  ;;  %v730_v16 = vmul.f32 0.044715, %v3064_v47  ;;  %v956_v62 = vmul.f32 0.7978846, %v892_v54 }
 0x144   : > { %v3091_v3 = vpop.f32.mrb[28].mxu0  ;;  %1477 = vmatprep.mubr.f32.mxu1 %v1142_v41  ;;  %3653 = vst [vmem:[#allocation43_spill] sm:$0xff] %v3094_v1  ;;  %v891_v44 = vadd.f32 %v827_v9, %v2763_v15  ;;  %v958_v31 = vmul.f32 0.7978846, %v894_v23  ;;  %v893_v59 = vadd.f32 %v829_v12, %v2770_v21  ;;  %v3106_v41 = vadd.f32 %v2999_v32, %v2708_v25 }
 0x145   : > { %v3098_v57 = vpop.f32.mrb[28].mxu1  ;;  %v3100_v11 = vpop.f32.mrb[29].mxu0  ;;  %1333 = vmatmul.mubr.f32.gmra.mrb[34].mxu0 %v1139_v0  ;;  %v1141_v58 = vmul.f32 %v1077_v36, %v2982_v30  ;;  %v3111_v54 = vmul.f32 %v728_v18, %v3042_v5  ;;  %2012 = vtanh.f32 %v956_v62  ;;  %v3115_v9 = vadd.f32 %v3005_v13, %v2710_v27 }
 0x146   : > { %v3108_v6 = vpop.f32.mrb[29].mxu1  ;;  %v955_v10 = vmul.f32 0.7978846, %v891_v44  ;;  %v3118_v30 = vmul.f32 0.5, %v2774_v24  ;;  %2014 = vtanh.f32 %v958_v31  ;;  %v957_v36 = vmul.f32 0.7978846, %v893_v59 }
 0x147   : > { %3654 = vst [vmem:[#allocation44_spill] sm:$0xff] %v3111_v54  ;;  %3655 = vst [vmem:[#allocation45_spill] sm:$0xff] %v3115_v9  ;;  %v2005_v0 = vpop.eup %2004  ;;  %1478 = vmatmul.mubr.f32.gmra.mrb[34].mxu1 %v1141_v58  ;;  %v3122_v32 = vadd.f32 %v3007_v61, %v2712_v28  ;;  %v3127_v62 = vmul.f32 %v730_v16, %v3064_v47  ;;  %v638_v13 = vmul.f32 0.5, %v2777_v26  ;;  %v731_v61 = vmul.f32 0.044715, %v3106_v41  ;;  %v3660_v47 = vld [vmem:[#allocation6_spill] sm:$0xff] }
 0x148   : > { %v3124_v23 = vpop.f32.mrb[30].mxu0  ;;  %v2007_v18 = vpop.eup %2006  ;;  %v1080_v12 = vadd.f32 1.0, %v2005_v0  ;;  %2016 = vtanh.f32 %v955_v10  ;;  %v3137_v59 = vadd.f32 %v3015_v34, %v2715_v33  ;;  %v733_v10 = vmul.f32 0.044715, %v3115_v9  ;;  %v3661_v54 = vld [vmem:[#allocation11_spill] sm:$0xff] }
 0x149   : > { %3656 = vst [vmem:[#allocation46_spill] sm:$0xff] %v3127_v62  ;;  %v3130_v44 = vpop.f32.mrb[30].mxu1  ;;  %v3132_v24 = vpop.f32.mrb[31].mxu0  ;;  %v1082_v31 = vadd.f32 1.0, %v2007_v18  ;;  %2018 = vtanh.f32 %v957_v36  ;;  %v832_v48 = vmul.f32 %v2861_v46, %v2797_v45  ;;  %v635_v2 = vmul.f32 0.5, %v2763_v15 }
 0x14a   : > { %v2009_v58 = vpop.eup %2008  ;;  %v3139_v0 = vpop.f32.mrb[31].mxu1  ;;  %v1144_v1 = vmul.f32 %v1080_v12, %v3010_v40  ;;  %v732_v8 = vmul.f32 0.044715, %v3122_v32  ;;  %v637_v62 = vmul.f32 0.5, %v2770_v21  ;;  %v3657_v12 = vld [vmem:[#allocation13_spill] sm:$0xff]  ;;  %v3163_v21 = vmul.f32 %v733_v10, %v3115_v9 }
 0x14b   : > { %v2011_v16 = vpop.eup %2010  ;;  %v1079_v26 = vadd.f32 1.0, %v2009_v58  ;;  %v1146_v18 = vmul.f32 %v1082_v31, %v3049_v43  ;;  %v896_v40 = vadd.f32 %v832_v48, %v2797_v45  ;;  %v834_v58 = vmul.f32 %v3657_v12, %v2804_v50  ;;  %v3658_v31 = vld [vmem:[#allocation5_spill] sm:$0xff] }
 0x14c   : > { %v1081_v36 = vadd.f32 1.0, %v2011_v16  ;;  %1337 = vmatprep.mubr.f32.mxu0 %v1144_v1  ;;  %v734_v43 = vmul.f32 0.044715, %v3137_v59  ;;  %v3659_v16 = vld [vmem:[#allocation10_spill] sm:$0xff]  ;;  %v833_v1 = vmul.f32 %v3661_v54, %v3660_v47  ;;  %3662 = vst [vmem:[#allocation13_spill] sm:$0xff] %v3163_v21  ;;  %v3173_v54 = vadd.f32 %v3029_v35, %v2708_v25 }
 0x14d   : > { %v1143_v34 = vmul.f32 %v1079_v26, %v3058_v19  ;;  %1482 = vmatprep.mubr.f32.mxu1 %v1146_v18  ;;  %v831_v15 = vmul.f32 %v3659_v16, %v3658_v31  ;;  %v3160_v19 = vmul.f32 %v731_v61, %v3106_v41  ;;  %v960_v48 = vmul.f32 0.7978846, %v896_v40  ;;  %v3664_v21 = vld [vmem:[#allocation18_spill] sm:$0xff] }
 0x14e   : > { %v1145_v46 = vmul.f32 %v1081_v36, %v3073_v52  ;;  %v898_v26 = vadd.f32 %v834_v58, %v2804_v50  ;;  %v3167_v52 = vmul.f32 %v732_v8, %v3122_v32  ;;  %v897_v36 = vadd.f32 %v833_v1, %v3660_v47 }
 0x14f   : > { %1338 = vmatmul.mubr.f32.gmra.mrb[36].mxu0 %v1143_v34  ;;  %v895_v18 = vadd.f32 %v831_v15, %v3658_v31  ;;  %v2013_v61 = vpop.eup %2012  ;;  %v640_v34 = vmul.f32 0.5, %v2797_v45  ;;  %2020 = vtanh.f32 %v960_v48  ;;  %v3178_v40 = vadd.f32 %v3044_v51, %v2710_v27 }
 0x150   : > { %1483 = vmatmul.mubr.f32.gmra.mrb[36].mxu1 %v1145_v46  ;;  %v962_v10 = vmul.f32 0.7978846, %v898_v26  ;;  %v2015_v12 = vpop.eup %2014  ;;  %v1084_v8 = vadd.f32 1.0, %v2013_v61  ;;  %v3181_v58 = vmul.f32 %v734_v43, %v3137_v59  ;;  %v961_v16 = vmul.f32 0.7978846, %v897_v36 }
 0x151   : > { %v959_v46 = vmul.f32 0.7978846, %v895_v18  ;;  %v1086_v1 = vadd.f32 1.0, %v2015_v12  ;;  %v3185_v35 = vadd.f32 %v3046_v17, %v2712_v28  ;;  %v3189_v45 = vadd.f32 %v3052_v53, %v2715_v33  ;;  %v3663_v53 = vld [vmem:[#allocation9_spill] sm:$0xff] }
 0x152   : > { %v2017_v15 = vpop.eup %2016  ;;  %2022 = vtanh.f32 %v962_v10  ;;  %v1148_v48 = vmul.f32 %v1084_v8, %v3118_v30  ;;  %v735_v43 = vmul.f32 0.044715, %v3173_v54  ;;  %v737_v61 = vmul.f32 0.044715, %v3178_v40 }
 0x153   : > { %v2019_v51 = vpop.eup %2018  ;;  %v1083_v26 = vadd.f32 1.0, %v2017_v15  ;;  %2024 = vtanh.f32 %v959_v46  ;;  %v1150_v18 = vmul.f32 %v1086_v1, %v638_v13  ;;  %v642_v17 = vmul.f32 0.5, %v2804_v50  ;;  %v3668_v1 = vld [vmem:[#allocation15_spill] sm:$0xff] }
 0x154   : > { %v1085_v36 = vadd.f32 1.0, %v2019_v51  ;;  %2026 = vtanh.f32 %v961_v16  ;;  %1342 = vmatprep.mubr.f32.mxu0 %v1148_v48  ;;  %v639_v12 = vmul.f32 0.5, %v3658_v31  ;;  %v836_v9 = vmul.f32 %v3664_v21, %v3663_v53  ;;  %v3665_v31 = vld [vmem:[#allocation7_spill] sm:$0xff]  ;;  %v3666_v16 = vld [vmem:[#allocation14_spill] sm:$0xff]  ;;  %v3667_v21 = vld [vmem:[#allocation8_spill] sm:$0xff] }
 0x155   : > { %v1147_v10 = vmul.f32 %v1083_v26, %v635_v2  ;;  %1487 = vmatprep.mubr.f32.mxu1 %v1150_v18  ;;  %v641_v8 = vmul.f32 0.5, %v3660_v47  ;;  %v3200_v46 = vmul.f32 0.5, %v3663_v53  ;;  %v838_v13 = vmul.f32 %v2908_v38, %v2844_v20 }
 0x156   : > { %v1149_v30 = vmul.f32 %v1085_v36, %v637_v62  ;;  %v3205_v2 = vmul.f32 %v735_v43, %v3173_v54  ;;  %v900_v50 = vadd.f32 %v836_v9, %v3663_v53  ;;  %v835_v15 = vmul.f32 %v3666_v16, %v3665_v31 }
 0x157   : > { %1343 = vmatmul.mubr.f32.gmra.mrb[38].mxu0 %v1147_v10  ;;  %v837_v62 = vmul.f32 %v3668_v1, %v3667_v21  ;;  %v3213_v47 = vmul.f32 %v737_v61, %v3178_v40  ;;  %v736_v51 = vmul.f32 0.044715, %v3185_v35  ;;  %v738_v38 = vmul.f32 0.044715, %v3189_v45 }
 0x158   : > { %1488 = vmatmul.mubr.f32.gmra.mrb[38].mxu1 %v1149_v30  ;;  %v902_v48 = vadd.f32 %v838_v13, %v2844_v20  ;;  %v964_v26 = vmul.f32 0.7978846, %v900_v50  ;;  %v899_v43 = vadd.f32 %v835_v15, %v3665_v31  ;;  %v3222_v18 = vadd.f32 %v3061_v4, %v2708_v25 }
 0x159   : > { %v901_v9 = vadd.f32 %v837_v62, %v3667_v21  ;;  %v2021_v36 = vpop.eup %2020  ;;  %v3226_v61 = vadd.f32 %v3068_v14, %v2710_v27  ;;  %v3230_v53 = vadd.f32 %v3070_v39, %v2712_v28  ;;  %v840_v30 = vmul.f32 %v2918_v56, %v2867_v49 }
 0x15a   : > { %v966_v10 = vmul.f32 0.7978846, %v902_v48  ;;  %v1088_v13 = vadd.f32 1.0, %v2021_v36  ;;  %2028 = vtanh.f32 %v964_v26  ;;  %v963_v50 = vmul.f32 0.7978846, %v899_v43 }
 0x15b   : > { %3669 = vst [vmem:[#allocation5_spill] sm:$0xff] %v3226_v61  ;;  %v965_v16 = vmul.f32 0.7978846, %v901_v9  ;;  %v3235_v4 = vmul.f32 %v736_v51, %v3185_v35  ;;  %v3238_v1 = vmul.f32 %v738_v38, %v3189_v45  ;;  %v646_v14 = vmul.f32 0.5, %v2844_v20 }
 0x15c   : > { %v2023_v15 = vpop.eup %2022  ;;  %2030 = vtanh.f32 %v966_v10  ;;  %v1152_v39 = vmul.f32 %v1088_v13, %v640_v34  ;;  %v3243_v56 = vadd.f32 %v3078_v55, %v2715_v33  ;;  %v739_v51 = vmul.f32 0.044715, %v3222_v18 }
 0x15d   : > { %v2025_v62 = vpop.eup %2024  ;;  %v1090_v48 = vadd.f32 1.0, %v2023_v15  ;;  %2032 = vtanh.f32 %v963_v50  ;;  %v741_v9 = vmul.f32 0.044715, %v3226_v61  ;;  %v740_v20 = vmul.f32 0.044715, %v3230_v53 }
 0x15e   : > { %v2027_v26 = vpop.eup %2026  ;;  %v1087_v43 = vadd.f32 1.0, %v2025_v62  ;;  %2034 = vtanh.f32 %v965_v16  ;;  %1347 = vmatprep.mubr.f32.mxu0 %v1152_v39  ;;  %v904_v34 = vadd.f32 %v840_v30, %v2867_v49  ;;  %v643_v13 = vmul.f32 0.5, %v3665_v31  ;;  %v3672_v30 = vld [vmem:[#allocation20_spill] sm:$0xff] }
 0x15f   : > { %v1154_v38 = vmul.f32 %v1090_v48, %v642_v17  ;;  %v1089_v36 = vadd.f32 1.0, %v2027_v26  ;;  %v645_v55 = vmul.f32 0.5, %v3667_v21  ;;  %v842_v50 = vmul.f32 %v2925_v42, %v2874_v63  ;;  %v3671_v21 = vld [vmem:[#allocation12_spill] sm:$0xff] }
 0x160   : > { %v1151_v10 = vmul.f32 %v1087_v43, %v639_v12  ;;  %v742_v15 = vmul.f32 0.044715, %v3243_v56  ;;  %v968_v62 = vmul.f32 0.7978846, %v904_v34  ;;  %v839_v17 = vmul.f32 %v2911_v60, %v2855_v37 }
 0x161   : > { %1492 = vmatprep.mubr.f32.mxu1 %v1154_v38  ;;  %v1153_v16 = vmul.f32 %v1089_v36, %v641_v8  ;;  %v3257_v39 = vmul.f32 %v739_v51, %v3222_v18  ;;  %v3260_v12 = vmul.f32 %v741_v9, %v3226_v61  ;;  %v906_v31 = vadd.f32 %v842_v50, %v2874_v63 }
 0x162   : > { %1348 = vmatmul.mubr.f32.gmra.mrb[40].mxu0 %v1151_v10  ;;  %v841_v42 = vmul.f32 %v3672_v30, %v3671_v21  ;;  %v3266_v8 = vmul.f32 %v740_v20, %v3230_v53  ;;  %2036 = vtanh.f32 %v968_v62  ;;  %v903_v48 = vadd.f32 %v839_v17, %v2855_v37 }
 0x163   : > { %3670 = vst [vmem:[#allocation10_spill] sm:$0xff] %v3260_v12  ;;  %1493 = vmatmul.mubr.f32.gmra.mrb[40].mxu1 %v1153_v16  ;;  %v3271_v60 = vadd.f32 %v3091_v3, %v2708_v25  ;;  %v648_v26 = vmul.f32 0.5, %v2867_v49  ;;  %v970_v43 = vmul.f32 0.7978846, %v906_v31  ;;  %v3277_v9 = vadd.f32 %v3098_v57, %v2710_v27  ;;  %v3673_v3 = vld [vmem:[#allocation26_spill] sm:$0xff]  ;;  %v3675_v12 = vld [vmem:[#allocation27_spill] sm:$0xff] }
 0x164   : > { %v905_v51 = vadd.f32 %v841_v42, %v3671_v21  ;;  %v2029_v38 = vpop.eup %2028  ;;  %v3280_v36 = vmul.f32 %v742_v15, %v3243_v56  ;;  %v967_v20 = vmul.f32 0.7978846, %v903_v48  ;;  %v3284_v34 = vadd.f32 %v3100_v11, %v2712_v28 }
 0x165   : > { %v844_v10 = vmul.f32 %v3673_v3, %v2894_v7  ;;  %v1092_v50 = vadd.f32 1.0, %v2029_v38  ;;  %v650_v16 = vmul.f32 0.5, %v2874_v63  ;;  %2038 = vtanh.f32 %v970_v43 }
 0x166   : > { %v2031_v49 = vpop.eup %2030  ;;  %v969_v62 = vmul.f32 0.7978846, %v905_v51  ;;  %2040 = vtanh.f32 %v967_v20  ;;  %v743_v15 = vmul.f32 0.044715, %v3271_v60  ;;  %v3292_v31 = vadd.f32 %v3108_v6, %v2715_v33 }
 0x167   : > { %v2033_v57 = vpop.eup %2032  ;;  %v1094_v17 = vadd.f32 1.0, %v2031_v49  ;;  %v1156_v30 = vmul.f32 %v1092_v50, %v3200_v46  ;;  %v745_v48 = vmul.f32 0.044715, %v3277_v9  ;;  %v744_v43 = vmul.f32 0.044715, %v3284_v34  ;;  %v3674_v49 = vld [vmem:[#allocation19_spill] sm:$0xff] }
 0x168   : > { %v2035_v11 = vpop.eup %2034  ;;  %v1091_v42 = vadd.f32 1.0, %v2033_v57  ;;  %2042 = vtanh.f32 %v969_v62  ;;  %v908_v51 = vadd.f32 %v844_v10, %v2894_v7  ;;  %v647_v3 = vmul.f32 0.5, %v2855_v37  ;;  %v3677_v57 = vld [vmem:[#allocation24_spill] sm:$0xff] }
 0x169   : > { %v1158_v38 = vmul.f32 %v1094_v17, %v646_v14  ;;  %v1093_v63 = vadd.f32 1.0, %v2035_v11  ;;  %1352 = vmatprep.mubr.f32.mxu0 %v1156_v30  ;;  %v649_v6 = vmul.f32 0.5, %v3671_v21  ;;  %v846_v61 = vmul.f32 %v3675_v12, %v3674_v49  ;;  %v3676_v14 = vld [vmem:[#allocation16_spill] sm:$0xff]  ;;  %v3678_v21 = vld [vmem:[#allocation17_spill] sm:$0xff] }
 0x16a   : > { %v1155_v20 = vmul.f32 %v1091_v42, %v643_v13  ;;  %v746_v50 = vmul.f32 0.044715, %v3292_v31  ;;  %v972_v62 = vmul.f32 0.7978846, %v908_v51  ;;  %v843_v17 = vmul.f32 %v3677_v57, %v3676_v14  ;;  %v3679_v11 = vld [vmem:[#allocation25_spill] sm:$0xff] }
 0x16b   : > { %1497 = vmatprep.mubr.f32.mxu1 %v1158_v38  ;;  %v1157_v46 = vmul.f32 %v1093_v63, %v645_v55  ;;  %v3306_v10 = vmul.f32 %v743_v15, %v3271_v60  ;;  %v3309_v13 = vmul.f32 %v745_v48, %v3277_v9  ;;  %v910_v37 = vadd.f32 %v846_v61, %v3674_v49 }
 0x16c   : > { %1353 = vmatmul.mubr.f32.gmra.mrb[42].mxu0 %v1155_v20  ;;  %v845_v12 = vmul.f32 %v3679_v11, %v3678_v21  ;;  %v2037_v30 = vpop.eup %2036  ;;  %v3315_v55 = vmul.f32 %v744_v43, %v3284_v34  ;;  %2044 = vtanh.f32 %v972_v62  ;;  %v907_v42 = vadd.f32 %v843_v17, %v3676_v14 }
 0x16d   : > { %1498 = vmatmul.mubr.f32.gmra.mrb[42].mxu1 %v1157_v46  ;;  %v3320_v15 = vadd.f32 %v3124_v23, %v2708_v25  ;;  %v1096_v38 = vadd.f32 1.0, %v2037_v30  ;;  %v974_v48 = vmul.f32 0.7978846, %v910_v37  ;;  %v3325_v61 = vadd.f32 %v3130_v44, %v2710_v27 }
 0x16e   : > { %v909_v63 = vadd.f32 %v845_v12, %v3678_v21  ;;  %v3328_v51 = vmul.f32 %v746_v50, %v3292_v31  ;;  %v971_v43 = vmul.f32 0.7978846, %v907_v42  ;;  %v3332_v20 = vadd.f32 %v3132_v24, %v2712_v28 }
 0x16f   : > { %3680 = vst [vmem:[#allocation6_spill] sm:$0xff] %v3320_v15  ;;  %3681 = vst [vmem:[#allocation11_spill] sm:$0xff] %v3325_v61  ;;  %v848_v25 = vmul.f32 %v2991_v29, %v2931_v22  ;;  %v2039_v23 = vpop.eup %2038  ;;  %v1160_v46 = vmul.f32 %v1096_v38, %v648_v26  ;;  %v652_v62 = vmul.f32 0.5, %v2894_v7  ;;  %2046 = vtanh.f32 %v974_v48  ;;  %v3683_v38 = vld [vmem:[#allocation23_spill] sm:$0xff]  ;;  %v3684_v48 = vld [vmem:[#allocation34_spill] sm:$0xff] }
 0x170   : > { %3682 = vst [vmem:[#allocation9_spill] sm:$0xff] %v3332_v20  ;;  %v973_v57 = vmul.f32 0.7978846, %v909_v63  ;;  %v2041_v17 = vpop.eup %2040  ;;  %v1098_v27 = vadd.f32 1.0, %v2039_v23  ;;  %v654_v44 = vmul.f32 0.5, %v3674_v49  ;;  %2048 = vtanh.f32 %v971_v43  ;;  %v3686_v23 = vld [vmem:[#allocation21_spill] sm:$0xff] }
 0x171   : > { %v747_v50 = vmul.f32 0.044715, %v3320_v15  ;;  %1357 = vmatprep.mubr.f32.mxu0 %v1160_v46  ;;  %v1095_v28 = vadd.f32 1.0, %v2041_v17  ;;  %v651_v24 = vmul.f32 0.5, %v3676_v14  ;;  %v749_v29 = vmul.f32 0.044715, %v3325_v61 }
 0x172   : > { %v2043_v37 = vpop.eup %2042  ;;  %2050 = vtanh.f32 %v973_v57  ;;  %v1162_v26 = vmul.f32 %v1098_v27, %v650_v16  ;;  %v748_v7 = vmul.f32 0.044715, %v3332_v20  ;;  %v912_v12 = vadd.f32 %v848_v25, %v2931_v22  ;;  %v3687_v46 = vld [vmem:[#allocation31_spill] sm:$0xff]  ;;  %v3691_v17 = vld [vmem:[#allocation30_spill] sm:$0xff] }
 0x173   : > { %v1097_v11 = vadd.f32 1.0, %v2043_v37  ;;  %v1159_v30 = vmul.f32 %v1095_v28, %v647_v3  ;;  %v653_v49 = vmul.f32 0.5, %v3678_v21  ;;  %v3346_v42 = vadd.f32 %v3139_v0, %v2715_v33  ;;  %v3689_v33 = vld [vmem:[#allocation22_spill] sm:$0xff]  ;;  %v3690_v0 = vld [vmem:[#allocation32_spill] sm:$0xff]  ;;  %v3692_v27 = vld [vmem:[#allocation39_spill] sm:$0xff] }
 0x174   : > { %v850_v63 = vmul.f32 %v3684_v48, %v3683_v38  ;;  %1502 = vmatprep.mubr.f32.mxu1 %v1162_v26  ;;  %v3351_v43 = vmul.f32 %v747_v50, %v3320_v15  ;;  %v976_v16 = vmul.f32 0.7978846, %v912_v12  ;;  %v847_v57 = vmul.f32 %v3687_v46, %v3686_v23  ;;  %v3694_v26 = vld [vmem:[#allocation33_spill] sm:$0xff] }
 0x175   : > { %v1161_v14 = vmul.f32 %v1097_v11, %v649_v6  ;;  %1358 = vmatmul.mubr.f32.gmra.mrb[44].mxu0 %v1159_v30  ;;  %v3356_v3 = vmul.f32 %v749_v29, %v3325_v61  ;;  %v849_v25 = vmul.f32 %v3690_v0, %v3689_v33  ;;  %v852_v37 = vmul.f32 %v3692_v27, %v3691_v17  ;;  %v3695_v11 = vld [vmem:[#allocation40_spill] sm:$0xff] }
 0x176   : > { %3685 = vst [vmem:[#allocation18_spill] sm:$0xff] %v3351_v43  ;;  %v914_v21 = vadd.f32 %v850_v63, %v3683_v38  ;;  %v2045_v6 = vpop.eup %2044  ;;  %v3364_v50 = vmul.f32 %v748_v7, %v3332_v20  ;;  %2052 = vtanh.f32 %v976_v16  ;;  %v911_v28 = vadd.f32 %v847_v57, %v3686_v23  ;;  %v3696_v27 = vld [vmem:[#allocation28_spill] sm:$0xff]  ;;  %v3697_v7 = vld [vmem:[#allocation37_spill] sm:$0xff] }
 0x177   : > { %3688 = vst [vmem:[#allocation7_spill] sm:$0xff] %v3356_v3  ;;  %1503 = vmatmul.mubr.f32.gmra.mrb[44].mxu1 %v1161_v14  ;;  %v854_v29 = vmul.f32 %v3695_v11, %v3694_v26  ;;  %v1100_v12 = vadd.f32 1.0, %v2045_v6  ;;  %v913_v48 = vadd.f32 %v849_v25, %v3689_v33  ;;  %v916_v63 = vadd.f32 %v852_v37, %v3691_v17 }
 0x178   : > { %3693 = vst [vmem:[#allocation14_spill] sm:$0xff] %v3364_v50  ;;  %v978_v30 = vmul.f32 0.7978846, %v914_v21  ;;  %v750_v46 = vmul.f32 0.044715, %v3346_v42  ;;  %v851_v3 = vmul.f32 %v3697_v7, %v3696_v27  ;;  %v3699_v50 = vld [vmem:[#allocation38_spill] sm:$0xff] }
 0x179   : > { %v975_v0 = vmul.f32 0.7978846, %v911_v28  ;;  %v918_v14 = vadd.f32 %v854_v29, %v3694_v26  ;;  %v2047_v16 = vpop.eup %2046  ;;  %v1164_v61 = vmul.f32 %v1100_v12, %v652_v62  ;;  %v977_v57 = vmul.f32 0.7978846, %v913_v48  ;;  %v3698_v29 = vld [vmem:[#allocation29_spill] sm:$0xff] }
 0x17a   : > { %2054 = vtanh.f32 %v978_v30  ;;  %v980_v43 = vmul.f32 0.7978846, %v916_v63  ;;  %v2049_v11 = vpop.eup %2048  ;;  %v1102_v6 = vadd.f32 1.0, %v2047_v16  ;;  %v915_v25 = vadd.f32 %v851_v3, %v3696_v27 }
 0x17b   : > { %2056 = vtanh.f32 %v975_v0  ;;  %v982_v21 = vmul.f32 0.7978846, %v918_v14  ;;  %1362 = vmatprep.mubr.f32.mxu0 %v1164_v61  ;;  %v1099_v15 = vadd.f32 1.0, %v2049_v11  ;;  %v656_v28 = vmul.f32 0.5, %v2931_v22  ;;  %v3700_v22 = vld [vmem:[#allocation44_spill] sm:$0xff]  ;;  %v3704_v14 = vld [vmem:[#allocation42_spill] sm:$0xff] }
 0x17c   : > { %v2051_v37 = vpop.eup %2050  ;;  %2058 = vtanh.f32 %v977_v57  ;;  %v853_v7 = vmul.f32 %v3699_v50, %v3698_v29  ;;  %v1166_v20 = vmul.f32 %v1102_v6, %v654_v44  ;;  %v979_v12 = vmul.f32 0.7978846, %v915_v25  ;;  %v3701_v50 = vld [vmem:[#allocation41_spill] sm:$0xff]  ;;  %v3705_v11 = vld [vmem:[#allocation36_spill] sm:$0xff]  ;;  %v3706_v6 = vld [vmem:[#allocation43_spill] sm:$0xff] }
 0x17d   : > { %v1101_v62 = vadd.f32 1.0, %v2051_v37  ;;  %2060 = vtanh.f32 %v980_v43  ;;  %v1163_v30 = vmul.f32 %v1099_v15, %v651_v24  ;;  %v658_v48 = vmul.f32 0.5, %v3683_v38  ;;  %v3702_v15 = vld [vmem:[#allocation46_spill] sm:$0xff]  ;;  %v3703_v38 = vld [vmem:[#allocation35_spill] sm:$0xff] }
 0x17e   : > { %2062 = vtanh.f32 %v982_v21  ;;  %v917_v63 = vadd.f32 %v853_v7, %v3698_v29  ;;  %1507 = vmatprep.mubr.f32.mxu1 %v1166_v20  ;;  %v3382_v61 = vmul.f32 %v750_v46, %v3346_v42  ;;  %v856_v0 = vmul.f32 %v3700_v22, %v3042_v5 }
 0x17f   : > { %v1165_v3 = vmul.f32 %v1101_v62, %v653_v49  ;;  %2064 = vtanh.f32 %v979_v12  ;;  %1363 = vmatmul.mubr.f32.gmra.mrb[46].mxu0 %v1163_v30  ;;  %v655_v44 = vmul.f32 0.5, %v3686_v23  ;;  %v858_v24 = vmul.f32 %v3702_v15, %v3701_v50 }
 0x180   : > { %v981_v43 = vmul.f32 0.7978846, %v917_v63  ;;  %v855_v16 = vmul.f32 %v3704_v14, %v3703_v38  ;;  %v2053_v57 = vpop.eup %2052  ;;  %v657_v20 = vmul.f32 0.5, %v3689_v33  ;;  %v660_v49 = vmul.f32 0.5, %v3691_v17 }
 0x181   : > { %1508 = vmatmul.mubr.f32.gmra.mrb[46].mxu1 %v1165_v3  ;;  %v920_v46 = vadd.f32 %v856_v0, %v3042_v5  ;;  %v857_v21 = vmul.f32 %v3706_v6, %v3705_v11  ;;  %v1104_v25 = vadd.f32 1.0, %v2053_v57  ;;  %v922_v23 = vadd.f32 %v858_v24, %v3701_v50 }
 0x182   : > { %2066 = vtanh.f32 %v981_v43  ;;  %v919_v37 = vadd.f32 %v855_v16, %v3703_v38  ;;  %v662_v7 = vmul.f32 0.5, %v3694_v26  ;;  %v860_v33 = vmul.f32 %v3167_v52, %v3122_v32 }
 0x183   : > { %v984_v62 = vmul.f32 0.7978846, %v920_v46  ;;  %v921_v12 = vadd.f32 %v857_v21, %v3705_v11  ;;  %v1168_v30 = vmul.f32 %v1104_v25, %v656_v28  ;;  %v986_v63 = vmul.f32 0.7978846, %v922_v23 }
 0x184   : > { %v2055_v17 = vpop.eup %2054  ;;  %v983_v3 = vmul.f32 0.7978846, %v919_v37  ;;  %v862_v22 = vmul.f32 %v3181_v58, %v3137_v59  ;;  %v924_v24 = vadd.f32 %v860_v33, %v3122_v32  ;;  %v659_v16 = vmul.f32 0.5, %v3696_v27 }
 0x185   : > { %v2057_v0 = vpop.eup %2056  ;;  %v1106_v43 = vadd.f32 1.0, %v2055_v17  ;;  %2068 = vtanh.f32 %v984_v62  ;;  %v985_v15 = vmul.f32 0.7978846, %v921_v12  ;;  %1367 = vmatprep.mubr.f32.mxu0 %v1168_v30  ;;  %v859_v27 = vmul.f32 %v3160_v19, %v3106_v41 }
 0x186   : > { %v2059_v26 = vpop.eup %2058  ;;  %v1103_v14 = vadd.f32 1.0, %v2057_v0  ;;  %2070 = vtanh.f32 %v986_v63  ;;  %v926_v52 = vadd.f32 %v862_v22, %v3137_v59  ;;  %v988_v6 = vmul.f32 0.7978846, %v924_v24  ;;  %v3708_v22 = vld [vmem:[#allocation13_spill] sm:$0xff] }
 0x187   : > { %v2061_v28 = vpop.eup %2060  ;;  %v1170_v57 = vmul.f32 %v1106_v43, %v658_v48  ;;  %v1105_v46 = vadd.f32 1.0, %v2059_v26  ;;  %2072 = vtanh.f32 %v983_v3  ;;  %v661_v48 = vmul.f32 0.5, %v3698_v29  ;;  %v3707_v3 = vld [vmem:[#allocation45_spill] sm:$0xff] }
 0x188   : > { %v2063_v58 = vpop.eup %2062  ;;  %v1167_v21 = vmul.f32 %v1103_v14, %v655_v44  ;;  %v1108_v25 = vadd.f32 1.0, %v2061_v28  ;;  %2074 = vtanh.f32 %v985_v15  ;;  %v990_v23 = vmul.f32 0.7978846, %v926_v52 }
 0x189   : > { %v2065_v37 = vpop.eup %2064  ;;  %1512 = vmatprep.mubr.f32.mxu1 %v1170_v57  ;;  %v1169_v62 = vmul.f32 %v1105_v46, %v657_v20  ;;  %v1110_v12 = vadd.f32 1.0, %v2063_v58  ;;  %2076 = vtanh.f32 %v988_v6  ;;  %v664_v44 = vmul.f32 0.5, %v3042_v5 }
 0x18a   : > { %1368 = vmatmul.mubr.f32.gmra.mrb[48].mxu0 %v1167_v21  ;;  %v1172_v33 = vmul.f32 %v1108_v25, %v660_v49  ;;  %v1107_v17 = vadd.f32 1.0, %v2065_v37  ;;  %2078 = vtanh.f32 %v990_v23  ;;  %v923_v63 = vadd.f32 %v859_v27, %v3106_v41 }
 0x18b   : > { %1513 = vmatmul.mubr.f32.gmra.mrb[48].mxu1 %v1169_v62  ;;  %v1174_v30 = vmul.f32 %v1110_v12, %v662_v7  ;;  %v861_v20 = vmul.f32 %v3708_v22, %v3707_v3  ;;  %v666_v19 = vmul.f32 0.5, %v3701_v50  ;;  %v864_v49 = vmul.f32 %v3235_v4, %v3185_v35 }
 0x18c   : > { %v2067_v0 = vpop.eup %2066  ;;  %1372 = vmatprep.mubr.f32.mxu0 %v1172_v33  ;;  %v1171_v43 = vmul.f32 %v1107_v17, %v659_v16  ;;  %v866_v29 = vmul.f32 %v3238_v1, %v3189_v45  ;;  %v663_v5 = vmul.f32 0.5, %v3703_v38  ;;  %v987_v15 = vmul.f32 0.7978846, %v923_v63 }
 0x18d   : > { %1517 = vmatprep.mubr.f32.mxu1 %v1174_v30  ;;  %v1109_v7 = vadd.f32 1.0, %v2067_v0  ;;  %v925_v24 = vadd.f32 %v861_v20, %v3707_v3  ;;  %v665_v26 = vmul.f32 0.5, %v3705_v11  ;;  %v928_v14 = vadd.f32 %v864_v49, %v3185_v35 }
 0x18e   : > { %1373 = vmatmul.mubr.f32.gmra.mrb[50].mxu0 %v1171_v43  ;;  %v930_v50 = vadd.f32 %v866_v29, %v3189_v45  ;;  %v863_v4 = vmul.f32 %v3205_v2, %v3173_v54  ;;  %2080 = vtanh.f32 %v987_v15  ;;  %v865_v38 = vmul.f32 %v3213_v47, %v3178_v40 }
 0x18f   : > { %v2069_v16 = vpop.eup %2068  ;;  %v1173_v52 = vmul.f32 %v1109_v7, %v661_v48  ;;  %v989_v1 = vmul.f32 0.7978846, %v925_v24  ;;  %v992_v46 = vmul.f32 0.7978846, %v928_v14  ;;  %v668_v25 = vmul.f32 0.5, %v3122_v32 }
 0x190   : > { %v2071_v28 = vpop.eup %2070  ;;  %v1112_v57 = vadd.f32 1.0, %v2069_v16  ;;  %v994_v6 = vmul.f32 0.7978846, %v930_v50  ;;  %v927_v11 = vadd.f32 %v863_v4, %v3173_v54  ;;  %v929_v2 = vadd.f32 %v865_v38, %v3178_v40 }
 0x191   : > { %v2073_v58 = vpop.eup %2072  ;;  %1518 = vmatmul.mubr.f32.gmra.mrb[50].mxu1 %v1173_v52  ;;  %v1114_v21 = vadd.f32 1.0, %v2071_v28  ;;  %2082 = vtanh.f32 %v989_v1  ;;  %v868_v32 = vmul.f32 %v3266_v8, %v3230_v53  ;;  %v667_v43 = vmul.f32 0.5, %v3106_v41 }
 0x192   : > { %v2075_v23 = vpop.eup %2074  ;;  %v1176_v37 = vmul.f32 %v1112_v57, %v664_v44  ;;  %v1111_v62 = vadd.f32 1.0, %v2073_v58  ;;  %2084 = vtanh.f32 %v992_v46  ;;  %v991_v12 = vmul.f32 0.7978846, %v927_v11 }
 0x193   : > { %v2077_v47 = vpop.eup %2076  ;;  %v1178_v27 = vmul.f32 %v1114_v21, %v666_v19  ;;  %v1113_v33 = vadd.f32 1.0, %v2075_v23  ;;  %2086 = vtanh.f32 %v994_v6  ;;  %v993_v17 = vmul.f32 0.7978846, %v929_v2 }
 0x194   : > { %v2079_v48 = vpop.eup %2078  ;;  %1377 = vmatprep.mubr.f32.mxu0 %v1176_v37  ;;  %v1175_v30 = vmul.f32 %v1111_v62, %v663_v5  ;;  %v1116_v63 = vadd.f32 1.0, %v2077_v47  ;;  %2088 = vtanh.f32 %v991_v12  ;;  %v670_v44 = vmul.f32 0.5, %v3137_v59  ;;  %v3709_v5 = vld [vmem:[#allocation5_spill] sm:$0xff]  ;;  %v3710_v59 = vld [vmem:[#allocation10_spill] sm:$0xff] }
 0x195   : > { %1522 = vmatprep.mubr.f32.mxu1 %v1178_v27  ;;  %v1177_v22 = vmul.f32 %v1113_v33, %v665_v26  ;;  %v1118_v20 = vadd.f32 1.0, %v2079_v48  ;;  %2090 = vtanh.f32 %v993_v17  ;;  %v932_v19 = vadd.f32 %v868_v32, %v3230_v53  ;;  %v3712_v32 = vld [vmem:[#allocation14_spill] sm:$0xff] }
 0x196   : > { %1378 = vmatmul.mubr.f32.gmra.mrb[52].mxu0 %v1175_v30  ;;  %v1180_v0 = vmul.f32 %v1116_v63, %v668_v25  ;;  %v870_v49 = vmul.f32 %v3280_v36, %v3243_v56  ;;  %v669_v7 = vmul.f32 0.5, %v3707_v3  ;;  %v867_v8 = vmul.f32 %v3257_v39, %v3222_v18  ;;  %v3711_v63 = vld [vmem:[#allocation9_spill] sm:$0xff] }
 0x197   : > { %1523 = vmatmul.mubr.f32.gmra.mrb[52].mxu1 %v1177_v22  ;;  %v1182_v29 = vmul.f32 %v1118_v20, %v670_v44  ;;  %v869_v15 = vmul.f32 %v3710_v59, %v3709_v5  ;;  %v672_v24 = vmul.f32 0.5, %v3185_v35  ;;  %v996_v26 = vmul.f32 0.7978846, %v932_v19  ;;  %v3714_v19 = vld [vmem:[#allocation18_spill] sm:$0xff]  ;;  %v3716_v59 = vld [vmem:[#allocation7_spill] sm:$0xff] }
 0x198   : > { %1382 = vmatprep.mubr.f32.mxu0 %v1180_v0  ;;  %v934_v41 = vadd.f32 %v870_v49, %v3243_v56  ;;  %v872_v14 = vmul.f32 %v3315_v55, %v3284_v34  ;;  %v2081_v36 = vpop.eup %2080  ;;  %v674_v50 = vmul.f32 0.5, %v3189_v45  ;;  %v931_v3 = vadd.f32 %v867_v8, %v3222_v18  ;;  %v3715_v8 = vld [vmem:[#allocation11_spill] sm:$0xff] }
 0x199   : > { %1527 = vmatprep.mubr.f32.mxu1 %v1182_v29  ;;  %v933_v39 = vadd.f32 %v869_v15, %v3709_v5  ;;  %v874_v4 = vmul.f32 %v3328_v51, %v3292_v31  ;;  %v1115_v16 = vadd.f32 1.0, %v2081_v36  ;;  %2092 = vtanh.f32 %v996_v26 }
 0x19a   : > { %v998_v35 = vmul.f32 0.7978846, %v934_v41  ;;  %v936_v52 = vadd.f32 %v872_v14, %v3284_v34  ;;  %v671_v38 = vmul.f32 0.5, %v3173_v54  ;;  %v995_v55 = vmul.f32 0.7978846, %v931_v3 }
 0x19b   : > { %v2083_v1 = vpop.eup %2082  ;;  %v997_v28 = vmul.f32 0.7978846, %v933_v39  ;;  %v938_v57 = vadd.f32 %v874_v4, %v3292_v31  ;;  %v1179_v46 = vmul.f32 %v1115_v16, %v667_v43  ;;  %v871_v25 = vmul.f32 %v3306_v10, %v3271_v60  ;;  %v3713_v43 = vld [vmem:[#allocation6_spill] sm:$0xff] }
 0x19c   : > { %v2085_v45 = vpop.eup %2084  ;;  %v1117_v6 = vadd.f32 1.0, %v2083_v1  ;;  %2094 = vtanh.f32 %v998_v35  ;;  %v1000_v11 = vmul.f32 0.7978846, %v936_v52  ;;  %v673_v37 = vmul.f32 0.5, %v3178_v40 }
 0x19d   : > { %v2087_v58 = vpop.eup %2086  ;;  %v1120_v21 = vadd.f32 1.0, %v2085_v45  ;;  %2096 = vtanh.f32 %v995_v55  ;;  %v1002_v51 = vmul.f32 0.7978846, %v938_v57  ;;  %1383 = vmatmul.mubr.f32.gmra.mrb[54].mxu0 %v1179_v46  ;;  %v935_v27 = vadd.f32 %v871_v25, %v3271_v60 }
 0x19e   : > { %v2089_v2 = vpop.eup %2088  ;;  %v1181_v23 = vmul.f32 %v1117_v6, %v669_v7  ;;  %v1122_v54 = vadd.f32 1.0, %v2087_v58  ;;  %2098 = vtanh.f32 %v997_v28  ;;  %v873_v10 = vmul.f32 %v3309_v13, %v3277_v9 }
 0x19f   : > { %v2091_v62 = vpop.eup %2090  ;;  %v1184_v12 = vmul.f32 %v1120_v21, %v672_v24  ;;  %v1119_v47 = vadd.f32 1.0, %v2089_v2  ;;  %2100 = vtanh.f32 %v1000_v11  ;;  %v999_v30 = vmul.f32 0.7978846, %v935_v27 }
 0x1a0   : > { %1528 = vmatmul.mubr.f32.gmra.mrb[54].mxu1 %v1181_v23  ;;  %v1186_v33 = vmul.f32 %v1122_v54, %v674_v50  ;;  %v1121_v17 = vadd.f32 1.0, %v2091_v62  ;;  %2102 = vtanh.f32 %v1002_v51  ;;  %v876_v40 = vmul.f32 %v3712_v32, %v3711_v63 }
 0x1a1   : > { %1387 = vmatprep.mubr.f32.mxu0 %v1184_v12  ;;  %v1183_v48 = vmul.f32 %v1119_v47, %v671_v38  ;;  %v937_v44 = vadd.f32 %v873_v10, %v3277_v9  ;;  %v878_v20 = vmul.f32 %v3382_v61, %v3346_v42  ;;  %2104 = vtanh.f32 %v999_v30 }
 0x1a2   : > { %1532 = vmatprep.mubr.f32.mxu1 %v1186_v33  ;;  %v1185_v22 = vmul.f32 %v1121_v17, %v673_v37  ;;  %v940_v0 = vadd.f32 %v876_v40, %v3711_v63  ;;  %v875_v13 = vmul.f32 %v3714_v19, %v3713_v43  ;;  %v877_v15 = vmul.f32 %v3716_v59, %v3715_v8 }
 0x1a3   : > { %1388 = vmatmul.mubr.f32.gmra.mrb[56].mxu0 %v1183_v48  ;;  %v2093_v49 = vpop.eup %2092  ;;  %v1001_v29 = vmul.f32 0.7978846, %v937_v44  ;;  %v942_v7 = vadd.f32 %v878_v20, %v3346_v42  ;;  %v676_v24 = vmul.f32 0.5, %v3230_v53  ;;  %v678_v36 = vmul.f32 0.5, %v3243_v56 }
 0x1a4   : > { %1533 = vmatmul.mubr.f32.gmra.mrb[56].mxu1 %v1185_v22  ;;  %v1124_v26 = vadd.f32 1.0, %v2093_v49  ;;  %v1004_v41 = vmul.f32 0.7978846, %v940_v0  ;;  %v939_v61 = vadd.f32 %v875_v13, %v3713_v43  ;;  %v941_v3 = vadd.f32 %v877_v15, %v3715_v8 }
 0x1a5   : > { %2106 = vtanh.f32 %v1001_v29  ;;  %v1006_v50 = vmul.f32 0.7978846, %v942_v7  ;;  %v675_v1 = vmul.f32 0.5, %v3222_v18  ;;  %v677_v56 = vmul.f32 0.5, %v3709_v5 }
 0x1a6   : > { %v2095_v14 = vpop.eup %2094  ;;  %v1188_v4 = vmul.f32 %v1124_v26, %v676_v24  ;;  %2108 = vtanh.f32 %v1004_v41  ;;  %v1003_v35 = vmul.f32 0.7978846, %v939_v61  ;;  %v1005_v38 = vmul.f32 0.7978846, %v941_v3 }
 0x1a7   : > { %v2097_v39 = vpop.eup %2096  ;;  %v1126_v16 = vadd.f32 1.0, %v2095_v14  ;;  %2110 = vtanh.f32 %v1006_v50  ;;  %v680_v6 = vmul.f32 0.5, %v3284_v34  ;;  %v682_v18 = vmul.f32 0.5, %v3292_v31 }
 0x1a8   : > { %v2099_v52 = vpop.eup %2098  ;;  %v1123_v53 = vadd.f32 1.0, %v2097_v39  ;;  %1392 = vmatprep.mubr.f32.mxu0 %v1188_v4  ;;  %2112 = vtanh.f32 %v1003_v35  ;;  %v679_v5 = vmul.f32 0.5, %v3271_v60  ;;  %v681_v62 = vmul.f32 0.5, %v3277_v9 }
 0x1a9   : > { %v2101_v55 = vpop.eup %2100  ;;  %v1190_v28 = vmul.f32 %v1126_v16, %v678_v36  ;;  %v1125_v57 = vadd.f32 1.0, %v2099_v52  ;;  %2114 = vtanh.f32 %v1005_v38  ;;  %v684_v31 = vmul.f32 0.5, %v3711_v63 }
 0x1aa   : > { %v2103_v45 = vpop.eup %2102  ;;  %v1187_v46 = vmul.f32 %v1123_v53, %v675_v1  ;;  %v1128_v11 = vadd.f32 1.0, %v2101_v55  ;;  %v686_v10 = vmul.f32 0.5, %v3346_v42  ;;  %v683_v32 = vmul.f32 0.5, %v3713_v43 }
 0x1ab   : > { %1537 = vmatprep.mubr.f32.mxu1 %v1190_v28  ;;  %v1189_v58 = vmul.f32 %v1125_v57, %v677_v56  ;;  %v1130_v21 = vadd.f32 1.0, %v2103_v45  ;;  %v2105_v25 = vpop.eup %2104  ;;  %v685_v22 = vmul.f32 0.5, %v3715_v8 }
 0x1ac   : > { %1393 = vmatmul.mubr.f32.gmra.mrb[58].mxu0 %v1187_v46  ;;  %v1192_v51 = vmul.f32 %v1128_v11, %v680_v6  ;;  %v1127_v23 = vadd.f32 1.0, %v2105_v25 }
 0x1ad   : > { %1538 = vmatmul.mubr.f32.gmra.mrb[58].mxu1 %v1189_v58  ;;  %v1194_v2 = vmul.f32 %v1130_v21, %v682_v18 }
 0x1ae   : > { %1397 = vmatprep.mubr.f32.mxu0 %v1192_v51  ;;  %v1191_v37 = vmul.f32 %v1127_v23, %v679_v5 }
 0x1af   : > { %1542 = vmatprep.mubr.f32.mxu1 %v1194_v2  ;;  %v2107_v54 = vpop.eup %2106 }
 0x1b0   : > { %v2109_v34 = vpop.eup %2108  ;;  %v1129_v12 = vadd.f32 1.0, %v2107_v54  ;;  %1398 = vmatmul.mubr.f32.gmra.mrb[60].mxu0 %v1191_v37 }
 0x1b1   : > { %v2111_v47 = vpop.eup %2110  ;;  %v1132_v27 = vadd.f32 1.0, %v2109_v34 }
 0x1b2   : > { %v2113_v33 = vpop.eup %2112  ;;  %v1193_v17 = vmul.f32 %v1129_v12, %v681_v62  ;;  %v1134_v48 = vadd.f32 1.0, %v2111_v47 }
 0x1b3   : > { %v2115_v30 = vpop.eup %2114  ;;  %v1196_v60 = vmul.f32 %v1132_v27, %v684_v31  ;;  %v1131_v40 = vadd.f32 1.0, %v2113_v33 }
 0x1b4   : > { %1543 = vmatmul.mubr.f32.gmra.mrb[60].mxu1 %v1193_v17  ;;  %v1198_v9 = vmul.f32 %v1134_v48, %v686_v10  ;;  %v1133_v44 = vadd.f32 1.0, %v2115_v30 }
 0x1b5   : > { %1402 = vmatprep.mubr.f32.mxu0 %v1196_v60  ;;  %v1195_v63 = vmul.f32 %v1131_v40, %v683_v32 }
 0x1b6   : > { %1547 = vmatprep.mubr.f32.mxu1 %v1198_v9  ;;  %v1197_v20 = vmul.f32 %v1133_v44, %v685_v22 }
 0x1b7   : > { %1403 = vmatmul.mubr.f32.gmra.mrb[62].mxu0 %v1195_v63 }
 0x1b8   : > { %1548 = vmatmul.mubr.f32.gmra.mrb[62].mxu1 %v1197_v20 }
 0x1ff   : > { %v1690_v42 = vpop.f32.mrb[32].mxu0 }
 0x200   : > { %v1691_v0 = vpop.f32.mrb[33].mxu0 }
 0x201   : > { %v1692_v19 = vadd.f32 %v1691_v0, %v1690_v42 }
 0x208   : > { %v1770_v13 = vpop.f32.mrb[32].mxu1 }
 0x209   : > { %v1771_v43 = vpop.f32.mrb[33].mxu1 }
 0x20a   : > { %v1772_v49 = vadd.f32 %v1771_v43, %v1770_v13 }
 0x20c   : > { %v1475_v29 = vadd.f32 %v1772_v49, %v1692_v19 }
 0x20e   : > { %1553 = vst [vmem:[%s3489_s28] sm:$0xff] %v1475_v29 }
 0x218   : > { %v1693_v7 = vpop.f32.mrb[34].mxu0 }
 0x219   : > { %v1694_v8 = vpop.f32.mrb[35].mxu0 }
 0x21a   : > { %v1773_v59 = vpop.f32.mrb[34].mxu1  ;;  %v1695_v15 = vadd.f32 %v1694_v8, %v1693_v7 }
 0x21b   : > { %v1774_v24 = vpop.f32.mrb[35].mxu1 }
 0x21c   : > { %v1775_v26 = vadd.f32 %v1774_v24, %v1773_v59 }
 0x21e   : > { %v1480_v41 = vadd.f32 %v1775_v26, %v1695_v15 }
 0x220   : > { %1554 = vst [vmem:[%s3489_s28 + $0x8] sm:$0xff] %v1480_v41 }
 0x222   : > { %v1696_v61 = vpop.f32.mrb[36].mxu0 }
 0x223   : > { %v1776_v14 = vpop.f32.mrb[36].mxu1  ;;  %v1697_v36 = vpop.f32.mrb[37].mxu0 }
 0x224   : > { %v1698_v50 = vadd.f32 %v1697_v36, %v1696_v61  ;;  %v1777_v3 = vpop.f32.mrb[37].mxu1 }
 0x225   : > { %v1778_v39 = vadd.f32 %v1777_v3, %v1776_v14 }
 0x227   : > { %v1485_v4 = vadd.f32 %v1778_v39, %v1698_v50 }
 0x229   : > { %1555 = vst [vmem:[%s3489_s28 + $0x10] sm:$0xff] %v1485_v4 }
 0x22a   : > { %v1699_v16 = vpop.f32.mrb[38].mxu0 }
 0x22b   : > { %v1779_v35 = vpop.f32.mrb[38].mxu1  ;;  %v1700_v52 = vpop.f32.mrb[39].mxu0 }
 0x22c   : > { %v1701_v1 = vadd.f32 %v1700_v52, %v1699_v16  ;;  %v1780_v53 = vpop.f32.mrb[39].mxu1 }
 0x22d   : > { %v1781_v38 = vadd.f32 %v1780_v53, %v1779_v35 }
 0x22f   : > { %v1490_v55 = vadd.f32 %v1781_v38, %v1701_v1 }
 0x231   : > { %1556 = vst [vmem:[%s3489_s28 + $0x18] sm:$0xff] %v1490_v55 }
 0x235   : > { %v1702_v28 = vpop.f32.mrb[40].mxu0 }
 0x236   : > { %v1782_v56 = vpop.f32.mrb[40].mxu1  ;;  %v1703_v57 = vpop.f32.mrb[41].mxu0 }
 0x237   : > { %v1704_v45 = vadd.f32 %v1703_v57, %v1702_v28  ;;  %v1783_v46 = vpop.f32.mrb[41].mxu1 }
 0x238   : > { %v1784_v6 = vadd.f32 %v1783_v46, %v1782_v56 }
 0x23a   : > { %v1495_v11 = vadd.f32 %v1784_v6, %v1704_v45 }
 0x23c   : > { %1557 = vst [vmem:[%s3489_s28 + $0x20] sm:$0xff] %v1495_v11 }
 0x23f   : > { %v1705_v58 = vpop.f32.mrb[42].mxu0 }
 0x240   : > { %v1785_v18 = vpop.f32.mrb[42].mxu1  ;;  %v1706_v21 = vpop.f32.mrb[43].mxu0 }
 0x241   : > { %v1707_v51 = vadd.f32 %v1706_v21, %v1705_v58  ;;  %v1786_v25 = vpop.f32.mrb[43].mxu1 }
 0x242   : > { %v1787_v2 = vadd.f32 %v1786_v25, %v1785_v18 }
 0x244   : > { %v1500_v5 = vadd.f32 %v1787_v2, %v1707_v51 }
 0x246   : > { %1558 = vst [vmem:[%s3489_s28 + $0x28] sm:$0xff] %v1500_v5 }
 0x248   : > { %v1708_v23 = vpop.f32.mrb[44].mxu0 }
 0x249   : > { %v1709_v37 = vpop.f32.mrb[45].mxu0 }
 0x24a   : > { %v1788_v54 = vpop.f32.mrb[44].mxu1  ;;  %v1710_v34 = vadd.f32 %v1709_v37, %v1708_v23 }
 0x24b   : > { %v1789_v62 = vpop.f32.mrb[45].mxu1 }
 0x24c   : > { %v1790_v12 = vadd.f32 %v1789_v62, %v1788_v54 }
 0x24e   : > { %v1505_v47 = vadd.f32 %v1790_v12, %v1710_v34 }
 0x250   : > { %1559 = vst [vmem:[%s3489_s28 + $0x30] sm:$0xff] %v1505_v47 }
 0x252   : > { %v1711_v31 = vpop.f32.mrb[46].mxu0 }
 0x253   : > { %v1712_v33 = vpop.f32.mrb[47].mxu0 }
 0x254   : > { %v1791_v27 = vpop.f32.mrb[46].mxu1  ;;  %v1713_v17 = vadd.f32 %v1712_v33, %v1711_v31 }
 0x255   : > { %v1792_v10 = vpop.f32.mrb[47].mxu1 }
 0x256   : > { %v1793_v48 = vadd.f32 %v1792_v10, %v1791_v27 }
 0x258   : > { %v1510_v30 = vadd.f32 %v1793_v48, %v1713_v17 }
 0x25a   : > { %1560 = vst [vmem:[%s3489_s28 + $0x38] sm:$0xff] %v1510_v30 }
 0x25d   : > { %v1714_v60 = vpop.f32.mrb[48].mxu0 }
 0x25e   : > { %v1794_v32 = vpop.f32.mrb[48].mxu1  ;;  %v1715_v40 = vpop.f32.mrb[49].mxu0 }
 0x25f   : > { %v1716_v9 = vadd.f32 %v1715_v40, %v1714_v60  ;;  %v1795_v22 = vpop.f32.mrb[49].mxu1 }
 0x260   : > { %v1796_v44 = vadd.f32 %v1795_v22, %v1794_v32 }
 0x261   : > { %v1717_v63 = vpop.f32.mrb[50].mxu0 }
 0x262   : > { %v1515_v20 = vadd.f32 %v1796_v44, %v1716_v9  ;;  %v1718_v42 = vpop.f32.mrb[51].mxu0 }
 0x263   : > { %v1719_v0 = vadd.f32 %v1718_v42, %v1717_v63 }
 0x264   : > { %1561 = vst [vmem:[%s3489_s28 + $0x40] sm:$0xff] %v1515_v20  ;;  %v1797_v19 = vpop.f32.mrb[50].mxu1 }
 0x265   : > { %v1798_v13 = vpop.f32.mrb[51].mxu1 }
 0x266   : > { %v1799_v43 = vadd.f32 %v1798_v13, %v1797_v19 }
 0x268   : > { %v1520_v49 = vadd.f32 %v1799_v43, %v1719_v0 }
 0x269   : > { %v1720_v29 = vpop.f32.mrb[52].mxu0 }
 0x26a   : > { %1562 = vst [vmem:[%s3489_s28 + $0x48] sm:$0xff] %v1520_v49  ;;  %v1800_v7 = vpop.f32.mrb[52].mxu1  ;;  %v1721_v8 = vpop.f32.mrb[53].mxu0 }
 0x26b   : > { %v1722_v59 = vadd.f32 %v1721_v8, %v1720_v29  ;;  %v1801_v15 = vpop.f32.mrb[53].mxu1 }
 0x26c   : > { %v1802_v24 = vadd.f32 %v1801_v15, %v1800_v7 }
 0x26e   : > { %v1525_v26 = vadd.f32 %v1802_v24, %v1722_v59 }
 0x270   : > { %1563 = vst [vmem:[%s3489_s28 + $0x50] sm:$0xff] %v1525_v26  ;;  %v1723_v41 = vpop.f32.mrb[54].mxu0 }
 0x271   : > { %v1724_v61 = vpop.f32.mrb[55].mxu0 }
 0x272   : > { %v1725_v36 = vadd.f32 %v1724_v61, %v1723_v41 }
 0x273   : > { %v1803_v14 = vpop.f32.mrb[54].mxu1 }
 0x274   : > { %v1804_v50 = vpop.f32.mrb[55].mxu1 }
 0x275   : > { %v1805_v3 = vadd.f32 %v1804_v50, %v1803_v14 }
 0x276   : > { %v1726_v39 = vpop.f32.mrb[56].mxu0 }
 0x277   : > { %v1530_v4 = vadd.f32 %v1805_v3, %v1725_v36  ;;  %v1806_v16 = vpop.f32.mrb[56].mxu1  ;;  %v1727_v35 = vpop.f32.mrb[57].mxu0 }
 0x278   : > { %v1728_v52 = vadd.f32 %v1727_v35, %v1726_v39  ;;  %v1807_v1 = vpop.f32.mrb[57].mxu1 }
 0x279   : > { %1564 = vst [vmem:[%s3489_s28 + $0x58] sm:$0xff] %v1530_v4  ;;  %v1808_v53 = vadd.f32 %v1807_v1, %v1806_v16 }
 0x27b   : > { %v1535_v38 = vadd.f32 %v1808_v53, %v1728_v52 }
 0x27d   : > { %1565 = vst [vmem:[%s3489_s28 + $0x60] sm:$0xff] %v1535_v38 }
 0x27f   : > { %v1729_v55 = vpop.f32.mrb[58].mxu0 }
 0x280   : > { %v1809_v28 = vpop.f32.mrb[58].mxu1  ;;  %v1730_v56 = vpop.f32.mrb[59].mxu0 }
 0x281   : > { %v1731_v57 = vadd.f32 %v1730_v56, %v1729_v55  ;;  %v1810_v45 = vpop.f32.mrb[59].mxu1 }
 0x282   : > { %v1811_v46 = vadd.f32 %v1810_v45, %v1809_v28 }
 0x283   : > { %v1732_v11 = vpop.f32.mrb[60].mxu0 }
 0x284   : > { %v1540_v6 = vadd.f32 %v1811_v46, %v1731_v57  ;;  %v1733_v58 = vpop.f32.mrb[61].mxu0 }
 0x285   : > { %v1734_v18 = vadd.f32 %v1733_v58, %v1732_v11 }
 0x286   : > { %1566 = vst [vmem:[%s3489_s28 + $0x68] sm:$0xff] %v1540_v6 }
 0x287   : > { %v1812_v21 = vpop.f32.mrb[60].mxu1 }
 0x288   : > { %v1813_v51 = vpop.f32.mrb[61].mxu1 }
 0x289   : > { %v1814_v25 = vadd.f32 %v1813_v51, %v1812_v21 }
 0x28a   : > { %v1735_v2 = vpop.f32.mrb[62].mxu0 }
 0x28b   : > { %v1545_v5 = vadd.f32 %v1814_v25, %v1734_v18  ;;  %v1815_v23 = vpop.f32.mrb[62].mxu1  ;;  %v1736_v54 = vpop.f32.mrb[63].mxu0 }
 0x28c   : > { %v1737_v37 = vadd.f32 %v1736_v54, %v1735_v2  ;;  %v1816_v34 = vpop.f32.mrb[63].mxu1 }
 0x28d   : > { %1567 = vst [vmem:[%s3489_s28 + $0x70] sm:$0xff] %v1545_v5  ;;  %v1817_v62 = vadd.f32 %v1816_v34, %v1815_v23 }
 0x28f   : > { %v1550_v12 = vadd.f32 %v1817_v62, %v1737_v37 }
 0x291   : > { %1568 = vst [vmem:[%s3489_s28 + $0x78] sm:$0xff] %v1550_v12 }
 0x292   : > { %2129 = shalt.err (!%p2126_p3)
}
 0x293   : > { %s2130_s11 = scalar_lea.hbm %s3511_s30, 2048  ;;  %s2134_s20 = scalar_lea.hbm %s3563_s4, 8192 }
 0x294   : > { %p2131_p4 = scmp.ne.s32.totalorder %s3511_s30, %s2130_s11  ;;  %p2135_p9 = scmp.lt.u32.totalorder %s3511_s30, %s3563_s4 }
 0x295   : > { %p2136_p10 = scmp.lt.u32.totalorder %s2134_s20, %s2130_s11  ;;  %p2138_p12 = scmp.lt.u32.totalorder %s2130_s11, %s3511_s30 }
 0x296   : > { %p2132_p7 = pnand %p2131_p4, %p2247_p5 }
 0x297   : > { %p2137_p11 = por %p2136_p10, %p2135_p9 }
 0x298   : > { %p2133_p8 = pneg %p2132_p7 }
 0x299   : > { %p2139_p13 = por %p2138_p12, %p2137_p11 }
 0x29b   : > { %p2140_p0 = pnand %p2139_p13, %p2133_p8 }
 0x29d   : > { %2143 = shalt.err (!%p2140_p0)
}
 0x29e   : > { %s2182_s14 = smov 128   ;;  %s2183_s28 = smov 8  }
 0x29f   : > { %1946 = dma.vmem_to_hbm [thread:$0]  (%p2247_p5), %s3513_s5, 2048, %s3511_s30, %s3518_s8, %s2182_s14, %s2182_s14, %s2183_s28  }
 0x2a0 PF: > { %p1952_p1 = scmp.ge.s32.totalorder %s2178_s18, 2  ;;  %s1598_s29 = sand.u32 1, %s2166_s15  }
 0x2a1   : > { %s1599_s6 = scalar_lea.sflag [#allocation3], %s1598_s29 }
 0x2a2   : > { %p1949_p2 = pnand %p1952_p1, %p2251_p6 }
 0x2a4   : > { %2161 = dma.done.wait (!%p1949_p2), %s1599_s6, 2048  }
 0x2a5   : > { %2163 = vsyncadd (!%p1949_p2), %s1599_s6, 4294965248  ;;  %p14_p3 = scmp.ge.s32.totalorder %s2234_s21, 6   ;;  %s3717_s15 = smov %s2170_s16 }
 0x2a6   : > { %s3718_s16 = smov %s2174_s17  ;;  %s3719_s17 = smov %s2245_s24 }
 0x2a7   : > { %s3720_s18 = smov %s2234_s21  ;;  %16 = sbr.rel (!%p14_p3) target bundleno = 3 (0x3), region = 71 }
 0x2ae   :  { %1604 = vsyncpa [#allocation3], 1 }
 0x2af   :  { %1606 = vsyncpa [#allocation3 + $0x1], 1 }

</bundles_post_ra>
